<compile_context>
chip_gen: v5e
topology: v5e:2x2
jax: 0.10.0
libtpu: 0.0.40
codegen_flags: <defaults>
</compile_context>

<pallas_src>
import functools

import jax
import jax.numpy as jnp
import numpy as np
from jax import lax
from jax.experimental import pallas as pl
from jax.experimental.pallas import tpu as pltpu

LANE = 128  # TPU lane width; channel dims are padded to a multiple of this.


def _round_up(x, m):
    return (x + m - 1) // m * m


def _pick_row_tile(H, W, P, Cpi, Cpo, budget_bytes=4 * 1024 * 1024):
    """Largest divisor TH of H whose biggest per-buffer tile stays under budget."""
    best = 1
    for th in range(1, H + 1):
        if H % th:
            continue
        x_tile = (th + 2 * P) * (W + 2 * P) * Cpi * 2   # bf16 halo'd input tile
        conv_tile = th * W * Cpo * 4                    # fp32 conv / output tile
        if max(x_tile, conv_tile) <= budget_bytes:
            best = th
    return best


# ---------------------------------------------------------------------------
# Pass 1: KxK conv + per-tile BN partial statistics.
# ---------------------------------------------------------------------------
def _conv_stats_kernel(x_ref, w_ref, conv_ref, stats_ref, *, TH, W, K, P, C_in, C_out):
    # x_ref    : (TH+2P, W+2P, C_in)  bf16   halo'd, channel-padded input row tile
    # w_ref    : (K, K, C_in, C_out)  bf16   main conv weight (resident in VMEM)
    # conv_ref : (TH, W, C_out)       f32    pre-BN conv output tile
    # stats_ref: (2, C_out)           f32    [sum, sum-of-squares] over this tile
    x = x_ref[...]                                     # (TH+2P, Wp, C_in) bf16

    acc = jnp.zeros((TH * W, C_out), jnp.float32)
    for dx in range(K):
        # One sublane-offset slice per dx (K total); dy taps below are leading-dim
        # slices + layout-preserving reshapes (no per-tap full-input copies).
        xdx = x[:, dx:dx + W, :]                       # (TH+2P, W, C_in)
        for dy in range(K):
            patch = xdx[dy:dy + TH].reshape(TH * W, C_in)
            acc += jnp.dot(patch, w_ref[dy, dx],
                           preferred_element_type=jnp.float32)

    conv_ref[...] = acc.reshape(TH, W, C_out)

    # Single-pass BN partials in fp32 (finished as var = E[x^2] - mean^2 outside).
    s = jnp.sum(acc, axis=0, keepdims=True)            # (1, C_out)
    ss = jnp.sum(acc * acc, axis=0, keepdims=True)     # (1, C_out)
    stats_ref[...] = jnp.concatenate([s, ss], axis=0)


# ---------------------------------------------------------------------------
# Pass 2: folded-BN normalize + ReLU, recomputed 1x1 shortcut, add, ReLU.
# ---------------------------------------------------------------------------
def _bn_shortcut_relu_kernel(conv_ref, x_ref, ws_ref, scale_ref, shift_ref, out_ref,
                             *, TH, W, C_in, C_out):
    # conv_ref : (TH, W, C_out) f32    pre-BN conv tile
    # x_ref    : (TH, W, C_in)  bf16   lane-dense input tile (no halo needed for 1x1)
    # ws_ref   : (C_in, C_out)  bf16   1x1 shortcut weight
    y = jnp.maximum(conv_ref[...] * scale_ref[...] + shift_ref[...], 0.0)
    xin = x_ref[...].reshape(TH * W, C_in)
    sc = jnp.dot(xin, ws_ref[...],
                 preferred_element_type=jnp.float32).reshape(TH, W, C_out)
    out_ref[...] = jnp.maximum(y + sc, 0.0)


def residual_block(x_nchw, w_oihw, b, gamma, beta, ws_oi=None, *,
                   kernel_size, eps=1e-5, row_tile=None):
    """ResidualBlock forward.  x_nchw: (N, C_in, H, W) f32 -> (N, C_out, H, W) f32."""
    # Conv bias is exactly cancelled by the train-mode BN mean subtraction -> dropped.
    del b
    N, C_in, H, W = x_nchw.shape
    C_out = w_oihw.shape[0]
    K = kernel_size
    P = K // 2
    Wp = W + 2 * P
    Cpi = _round_up(C_in, LANE)
    Cpo = _round_up(C_out, LANE)

    if row_tile is not None and H % row_tile == 0:
        TH = row_tile
    else:
        TH = _pick_row_tile(H, W, P, Cpi, Cpo)         # output rows per grid step
    nH = H // TH

    # ---- glue: NCHW -> NHWC, bf16 cast, channel pad to lane width ----
    x_core = jnp.transpose(x_nchw, (0, 2, 3, 1)).astype(jnp.bfloat16)
    x_core = jnp.pad(x_core, ((0, 0), (0, 0), (0, 0), (0, Cpi - C_in)))  # (N,H,W,Cpi)
    x_halo = jnp.pad(x_core, ((0, 0), (P, P), (P, P), (0, 0)))           # (N,H+2P,Wp,Cpi)
    # Overlapping halo row tiles: (N, nH, TH+2P, Wp, Cpi).  Materializing the halo in
    # the wrapper keeps both grid axes "parallel" and lets BlockSpec double-buffer
    # every operand automatically (costs ~2P/TH extra input traffic).
    x_tiles = jnp.stack([x_halo[:, i * TH:i * TH + TH + 2 * P] for i in range(nH)],
                        axis=1)

    w = jnp.transpose(w_oihw, (2, 3, 1, 0)).astype(jnp.bfloat16)   # (K, K, Cin, Cout)
    w = jnp.pad(w, ((0, 0), (0, 0), (0, Cpi - C_in), (0, Cpo - C_out)))
    if ws_oi is None:                                   # identity shortcut (Cin == Cout)
        ws_oi = jnp.eye(C_out, C_in, dtype=x_nchw.dtype)
    ws = jnp.transpose(ws_oi, (1, 0)).astype(jnp.bfloat16)         # (Cin, Cout)
    ws = jnp.pad(ws, ((0, Cpi - C_in), (0, Cpo - C_out)))

    vmem = pl.BlockSpec(memory_space=pltpu.MemorySpace.VMEM)
    cparams = pltpu.CompilerParams(
        dimension_semantics=("parallel", "parallel"),   # megacore-shardable on v7x
        vmem_limit_bytes=32 * 1024 * 1024)              # explicit budget (<= v7x 64 MiB)

    # ---- pass 1: conv + BN partial statistics ----
    kernel1 = functools.partial(_conv_stats_kernel,
                                TH=TH, W=W, K=K, P=P, C_in=Cpi, C_out=Cpo)
    conv, stats = pl.pallas_call(
        kernel1,
        grid=(N, nH),
        in_specs=[
            pl.BlockSpec((None, None, TH + 2 * P, Wp, Cpi),
                         lambda n, i: (n, i, 0, 0, 0)),
            vmem,   # conv weight: loaded once, resident for the whole grid
        ],
        out_specs=[
            pl.BlockSpec((None, TH, W, Cpo), lambda n, i: (n, i, 0, 0)),
            pl.BlockSpec((None, None, 2, Cpo), lambda n, i: (n, i, 0, 0)),
        ],
        out_shape=(
            jax.ShapeDtypeStruct((N, H, W, Cpo), jnp.float32),   # conv (pre-BN)
            jax.ShapeDtypeStruct((N, nH, 2, Cpo), jnp.float32),  # per-tile stats
        ),
        compiler_params=cparams,
    )(x_tiles, w)

    # ---- finish BN statistics (tiny O(C) work) and fold gamma/beta in fp32 ----
    count = float(N * H * W)
    total = jnp.sum(stats, axis=(0, 1))                 # (2, Cpo)
    mean = total[0] / count
    var = jnp.maximum(total[1] / count - mean * mean, 0.0)
    rstd = lax.rsqrt(var + eps)
    gamma_p = jnp.pad(gamma.astype(jnp.float32), (0, Cpo - C_out))
    beta_p = jnp.pad(beta.astype(jnp.float32), (0, Cpo - C_out))
    scale = (gamma_p * rstd).reshape(1, Cpo)
    shift = (beta_p - mean * gamma_p * rstd).reshape(1, Cpo)

    # ---- pass 2: BN + ReLU + recomputed 1x1 shortcut + add + ReLU ----
    kernel2 = functools.partial(_bn_shortcut_relu_kernel,
                                TH=TH, W=W, C_in=Cpi, C_out=Cpo)
    out_pad = pl.pallas_call(
        kernel2,
        grid=(N, nH),
        in_specs=[
            pl.BlockSpec((None, TH, W, Cpo), lambda n, i: (n, i, 0, 0)),  # conv
            pl.BlockSpec((None, TH, W, Cpi), lambda n, i: (n, i, 0, 0)),  # input tile
            vmem,   # shortcut weight
            vmem,   # scale
            vmem,   # shift
        ],
        out_specs=pl.BlockSpec((None, TH, W, Cpo), lambda n, i: (n, i, 0, 0)),
        out_shape=jax.ShapeDtypeStruct((N, H, W, Cpo), jnp.float32),
        compiler_params=cparams,
    )(conv, x_core, ws, scale, shift)

    out = out_pad[:, :, :, :C_out]                      # drop channel padding
    return jnp.transpose(out, (0, 3, 1, 2))             # back to NCHW


def _reference(x_nchw, w_oihw, b, gamma, beta, ws_oi, *, kernel_size, eps=1e-5):
    """Pure-JAX reference of the PyTorch forward (train-mode BN).  The conv inputs are
    rounded to bf16 exactly like the kernel's MXU feed; all arithmetic is fp32."""
    P = kernel_size // 2
    xq = x_nchw.astype(jnp.bfloat16).astype(jnp.float32)
    wq = w_oihw.astype(jnp.bfloat16).astype(jnp.float32)
    wsq = ws_oi.astype(jnp.bfloat16).astype(jnp.float32)
    conv = lax.conv_general_dilated(
        xq, wq, window_strides=(1, 1), padding=[(P, P), (P, P)],
        dimension_numbers=("NCHW", "OIHW", "NCHW"),
        precision=lax.Precision.HIGHEST)
    conv = conv + b[None, :, None, None]   # cancelled by BN; kept for fidelity
    mean = jnp.mean(conv, axis=(0, 2, 3), keepdims=True)
    var = jnp.mean((conv - mean) ** 2, axis=(0, 2, 3), keepdims=True)
    y = gamma[None, :, None, None] * (conv - mean) * lax.rsqrt(var + eps) \
        + beta[None, :, None, None]
    y = jnp.maximum(y, 0.0)
    sc = lax.conv_general_dilated(
        xq, wsq[:, :, None, None], window_strides=(1, 1), padding="VALID",
        dimension_numbers=("NCHW", "OIHW", "NCHW"),
        precision=lax.Precision.HIGHEST)
    return jnp.maximum(y + sc, 0.0)


if __name__ == "__main__":
    # Small shapes consistent with the module; Cin != Cout exercises the 1x1 shortcut.
    N, C_in, C_out, H, W, K = 2, 4, 8, 16, 16, 3

    key = jax.random.PRNGKey(0)
    kx, kw, kb, kg, kbt, kws = jax.random.split(key, 6)
    x = jax.random.normal(kx, (N, C_in, H, W), jnp.float32)
    w = jax.random.normal(kw, (C_out, C_in, K, K), jnp.float32) * 0.1   # conv weight
    b = jax.random.normal(kb, (C_out,), jnp.float32) * 0.1              # conv bias
    gamma = 1.0 + 0.1 * jax.random.normal(kg, (C_out,), jnp.float32)    # BN weight
    beta = 0.1 * jax.random.normal(kbt, (C_out,), jnp.float32)          # BN bias
    ws = jax.random.normal(kws, (C_out, C_in), jnp.float32) * 0.1       # 1x1 shortcut

    out = residual_block(x, w, b, gamma, beta, ws, kernel_size=K)
    out = jax.block_until_ready(out)

    ref = jax.block_until_ready(
        _reference(x, w, b, gamma, beta, ws, kernel_size=K))
    np.testing.assert_allclose(np.asarray(out), np.asarray(ref),
                               rtol=2e-3, atol=2e-3)
    print("KERNEL_OK")
</pallas_src>

<mosaic_0001>
module attributes {stable_mosaic.version = 11 : i64} {
  func.func @_conv_stats_kernel(%arg0: i32, %arg1: i32, %arg2: memref<1x1x18x18x128xbf16, #tpu.memory_space<vmem>>, %arg3: memref<3x3x128x128xbf16, #tpu.memory_space<vmem>>, %arg4: memref<1x16x16x128xf32, #tpu.memory_space<vmem>>, %arg5: memref<1x1x2x128xf32, #tpu.memory_space<vmem>>) attributes {dimension_semantics = [#tpu.dimension_semantics<parallel>, #tpu.dimension_semantics<parallel>], iteration_bounds = array<i64: 2, 1>, scalar_prefetch = 0 : i64, scratch_operands = 0 : i64, tpu.core_type = #tpu.core_type<tc>, window_params = [{transform_indices = @transform_0, window_bounds = array<i64: 1, 1, 18, 18, 128>}, {pipeline_mode = #tpu.pipeline_mode<synchronous>, transform_indices = @transform_1, window_bounds = array<i64: 3, 3, 128, 128>}, {transform_indices = @transform_2, window_bounds = array<i64: 1, 16, 16, 128>}, {transform_indices = @transform_3, window_bounds = array<i64: 1, 1, 2, 128>}]} {
    %c0 = arith.constant 0 : index
    %c0_0 = arith.constant 0 : index
    %c0_1 = arith.constant 0 : index
    %c0_2 = arith.constant 0 : index
    %c0_3 = arith.constant 0 : index
    %0 = vector.load %arg2[%c0, %c0_0, %c0_1, %c0_2, %c0_3] : memref<1x1x18x18x128xbf16, #tpu.memory_space<vmem>>, vector<1x1x18x18x128xbf16>
    %1 = vector.shape_cast %0 : vector<1x1x18x18x128xbf16> to vector<18x18x128xbf16>
    %cst = arith.constant 0.000000e+00 : f32
    %2 = vector.broadcast %cst : f32 to vector<256x128xf32>
    %3 = vector.extract_strided_slice %1 {offsets = [0, 0, 0], sizes = [18, 16, 128], strides = [1, 1, 1]} : vector<18x18x128xbf16> to vector<18x16x128xbf16>
    %4 = vector.extract_strided_slice %3 {offsets = [0, 0, 0], sizes = [16, 16, 128], strides = [1, 1, 1]} : vector<18x16x128xbf16> to vector<16x16x128xbf16>
    %5 = vector.shape_cast %4 : vector<16x16x128xbf16> to vector<256x128xbf16>
    %c0_4 = arith.constant 0 : index
    %c0_5 = arith.constant 0 : index
    %c0_6 = arith.constant 0 : index
    %c0_7 = arith.constant 0 : index
    %6 = vector.load %arg3[%c0_4, %c0_5, %c0_6, %c0_7] : memref<3x3x128x128xbf16, #tpu.memory_space<vmem>>, vector<1x1x128x128xbf16>
    %7 = vector.shape_cast %6 : vector<1x1x128x128xbf16> to vector<128x128xbf16>
    %cst_8 = arith.constant dense<0.000000e+00> : vector<256x128xf32>
    %8 = tpu.matmul %5, %7, %cst_8 {dimension_numbers = #tpu.dot_dimension_numbers<[1], [0], [0], [1], [0, 0, 1, 1], [], []>} : vector<256x128xbf16>, vector<128x128xbf16>, vector<256x128xf32> -> vector<256x128xf32>
    %9 = arith.addf %2, %8 : vector<256x128xf32>
    %10 = vector.extract_strided_slice %3 {offsets = [1, 0, 0], sizes = [16, 16, 128], strides = [1, 1, 1]} : vector<18x16x128xbf16> to vector<16x16x128xbf16>
    %11 = vector.shape_cast %10 : vector<16x16x128xbf16> to vector<256x128xbf16>
    %c1 = arith.constant 1 : index
    %c0_9 = arith.constant 0 : index
    %c0_10 = arith.constant 0 : index
    %c0_11 = arith.constant 0 : index
    %12 = vector.load %arg3[%c1, %c0_9, %c0_10, %c0_11] : memref<3x3x128x128xbf16, #tpu.memory_space<vmem>>, vector<1x1x128x128xbf16>
    %13 = vector.shape_cast %12 : vector<1x1x128x128xbf16> to vector<128x128xbf16>
    %cst_12 = arith.constant dense<0.000000e+00> : vector<256x128xf32>
    %14 = tpu.matmul %11, %13, %cst_12 {dimension_numbers = #tpu.dot_dimension_numbers<[1], [0], [0], [1], [0, 0, 1, 1], [], []>} : vector<256x128xbf16>, vector<128x128xbf16>, vector<256x128xf32> -> vector<256x128xf32>
    %15 = arith.addf %9, %14 : vector<256x128xf32>
    %16 = vector.extract_strided_slice %3 {offsets = [2, 0, 0], sizes = [16, 16, 128], strides = [1, 1, 1]} : vector<18x16x128xbf16> to vector<16x16x128xbf16>
    %17 = vector.shape_cast %16 : vector<16x16x128xbf16> to vector<256x128xbf16>
    %c2 = arith.constant 2 : index
    %c0_13 = arith.constant 0 : index
    %c0_14 = arith.constant 0 : index
    %c0_15 = arith.constant 0 : index
    %18 = vector.load %arg3[%c2, %c0_13, %c0_14, %c0_15] : memref<3x3x128x128xbf16, #tpu.memory_space<vmem>>, vector<1x1x128x128xbf16>
    %19 = vector.shape_cast %18 : vector<1x1x128x128xbf16> to vector<128x128xbf16>
    %cst_16 = arith.constant dense<0.000000e+00> : vector<256x128xf32>
    %20 = tpu.matmul %17, %19, %cst_16 {dimension_numbers = #tpu.dot_dimension_numbers<[1], [0], [0], [1], [0, 0, 1, 1], [], []>} : vector<256x128xbf16>, vector<128x128xbf16>, vector<256x128xf32> -> vector<256x128xf32>
    %21 = arith.addf %15, %20 : vector<256x128xf32>
    %22 = vector.extract_strided_slice %1 {offsets = [0, 1, 0], sizes = [18, 16, 128], strides = [1, 1, 1]} : vector<18x18x128xbf16> to vector<18x16x128xbf16>
    %23 = vector.extract_strided_slice %22 {offsets = [0, 0, 0], sizes = [16, 16, 128], strides = [1, 1, 1]} : vector<18x16x128xbf16> to vector<16x16x128xbf16>
    %24 = vector.shape_cast %23 : vector<16x16x128xbf16> to vector<256x128xbf16>
    %c0_17 = arith.constant 0 : index
    %c1_18 = arith.constant 1 : index
    %c0_19 = arith.constant 0 : index
    %c0_20 = arith.constant 0 : index
    %25 = vector.load %arg3[%c0_17, %c1_18, %c0_19, %c0_20] : memref<3x3x128x128xbf16, #tpu.memory_space<vmem>>, vector<1x1x128x128xbf16>
    %26 = vector.shape_cast %25 : vector<1x1x128x128xbf16> to vector<128x128xbf16>
    %cst_21 = arith.constant dense<0.000000e+00> : vector<256x128xf32>
    %27 = tpu.matmul %24, %26, %cst_21 {dimension_numbers = #tpu.dot_dimension_numbers<[1], [0], [0], [1], [0, 0, 1, 1], [], []>} : vector<256x128xbf16>, vector<128x128xbf16>, vector<256x128xf32> -> vector<256x128xf32>
    %28 = arith.addf %21, %27 : vector<256x128xf32>
    %29 = vector.extract_strided_slice %22 {offsets = [1, 0, 0], sizes = [16, 16, 128], strides = [1, 1, 1]} : vector<18x16x128xbf16> to vector<16x16x128xbf16>
    %30 = vector.shape_cast %29 : vector<16x16x128xbf16> to vector<256x128xbf16>
    %c1_22 = arith.constant 1 : index
    %c1_23 = arith.constant 1 : index
    %c0_24 = arith.constant 0 : index
    %c0_25 = arith.constant 0 : index
    %31 = vector.load %arg3[%c1_22, %c1_23, %c0_24, %c0_25] : memref<3x3x128x128xbf16, #tpu.memory_space<vmem>>, vector<1x1x128x128xbf16>
    %32 = vector.shape_cast %31 : vector<1x1x128x128xbf16> to vector<128x128xbf16>
    %cst_26 = arith.constant dense<0.000000e+00> : vector<256x128xf32>
    %33 = tpu.matmul %30, %32, %cst_26 {dimension_numbers = #tpu.dot_dimension_numbers<[1], [0], [0], [1], [0, 0, 1, 1], [], []>} : vector<256x128xbf16>, vector<128x128xbf16>, vector<256x128xf32> -> vector<256x128xf32>
    %34 = arith.addf %28, %33 : vector<256x128xf32>
    %35 = vector.extract_strided_slice %22 {offsets = [2, 0, 0], sizes = [16, 16, 128], strides = [1, 1, 1]} : vector<18x16x128xbf16> to vector<16x16x128xbf16>
    %36 = vector.shape_cast %35 : vector<16x16x128xbf16> to vector<256x128xbf16>
    %c2_27 = arith.constant 2 : index
    %c1_28 = arith.constant 1 : index
    %c0_29 = arith.constant 0 : index
    %c0_30 = arith.constant 0 : index
    %37 = vector.load %arg3[%c2_27, %c1_28, %c0_29, %c0_30] : memref<3x3x128x128xbf16, #tpu.memory_space<vmem>>, vector<1x1x128x128xbf16>
    %38 = vector.shape_cast %37 : vector<1x1x128x128xbf16> to vector<128x128xbf16>
    %cst_31 = arith.constant dense<0.000000e+00> : vector<256x128xf32>
    %39 = tpu.matmul %36, %38, %cst_31 {dimension_numbers = #tpu.dot_dimension_numbers<[1], [0], [0], [1], [0, 0, 1, 1], [], []>} : vector<256x128xbf16>, vector<128x128xbf16>, vector<256x128xf32> -> vector<256x128xf32>
    %40 = arith.addf %34, %39 : vector<256x128xf32>
    %41 = vector.extract_strided_slice %1 {offsets = [0, 2, 0], sizes = [18, 16, 128], strides = [1, 1, 1]} : vector<18x18x128xbf16> to vector<18x16x128xbf16>
    %42 = vector.extract_strided_slice %41 {offsets = [0, 0, 0], sizes = [16, 16, 128], strides = [1, 1, 1]} : vector<18x16x128xbf16> to vector<16x16x128xbf16>
    %43 = vector.shape_cast %42 : vector<16x16x128xbf16> to vector<256x128xbf16>
    %c0_32 = arith.constant 0 : index
    %c2_33 = arith.constant 2 : index
    %c0_34 = arith.constant 0 : index
    %c0_35 = arith.constant 0 : index
    %44 = vector.load %arg3[%c0_32, %c2_33, %c0_34, %c0_35] : memref<3x3x128x128xbf16, #tpu.memory_space<vmem>>, vector<1x1x128x128xbf16>
    %45 = vector.shape_cast %44 : vector<1x1x128x128xbf16> to vector<128x128xbf16>
    %cst_36 = arith.constant dense<0.000000e+00> : vector<256x128xf32>
    %46 = tpu.matmul %43, %45, %cst_36 {dimension_numbers = #tpu.dot_dimension_numbers<[1], [0], [0], [1], [0, 0, 1, 1], [], []>} : vector<256x128xbf16>, vector<128x128xbf16>, vector<256x128xf32> -> vector<256x128xf32>
    %47 = arith.addf %40, %46 : vector<256x128xf32>
    %48 = vector.extract_strided_slice %41 {offsets = [1, 0, 0], sizes = [16, 16, 128], strides = [1, 1, 1]} : vector<18x16x128xbf16> to vector<16x16x128xbf16>
    %49 = vector.shape_cast %48 : vector<16x16x128xbf16> to vector<256x128xbf16>
    %c1_37 = arith.constant 1 : index
    %c2_38 = arith.constant 2 : index
    %c0_39 = arith.constant 0 : index
    %c0_40 = arith.constant 0 : index
    %50 = vector.load %arg3[%c1_37, %c2_38, %c0_39, %c0_40] : memref<3x3x128x128xbf16, #tpu.memory_space<vmem>>, vector<1x1x128x128xbf16>
    %51 = vector.shape_cast %50 : vector<1x1x128x128xbf16> to vector<128x128xbf16>
    %cst_41 = arith.constant dense<0.000000e+00> : vector<256x128xf32>
    %52 = tpu.matmul %49, %51, %cst_41 {dimension_numbers = #tpu.dot_dimension_numbers<[1], [0], [0], [1], [0, 0, 1, 1], [], []>} : vector<256x128xbf16>, vector<128x128xbf16>, vector<256x128xf32> -> vector<256x128xf32>
    %53 = arith.addf %47, %52 : vector<256x128xf32>
    %54 = vector.extract_strided_slice %41 {offsets = [2, 0, 0], sizes = [16, 16, 128], strides = [1, 1, 1]} : vector<18x16x128xbf16> to vector<16x16x128xbf16>
    %55 = vector.shape_cast %54 : vector<16x16x128xbf16> to vector<256x128xbf16>
    %c2_42 = arith.constant 2 : index
    %c2_43 = arith.constant 2 : index
    %c0_44 = arith.constant 0 : index
    %c0_45 = arith.constant 0 : index
    %56 = vector.load %arg3[%c2_42, %c2_43, %c0_44, %c0_45] : memref<3x3x128x128xbf16, #tpu.memory_space<vmem>>, vector<1x1x128x128xbf16>
    %57 = vector.shape_cast %56 : vector<1x1x128x128xbf16> to vector<128x128xbf16>
    %cst_46 = arith.constant dense<0.000000e+00> : vector<256x128xf32>
    %58 = tpu.matmul %55, %57, %cst_46 {dimension_numbers = #tpu.dot_dimension_numbers<[1], [0], [0], [1], [0, 0, 1, 1], [], []>} : vector<256x128xbf16>, vector<128x128xbf16>, vector<256x128xf32> -> vector<256x128xf32>
    %59 = arith.addf %53, %58 : vector<256x128xf32>
    %60 = vector.shape_cast %59 : vector<256x128xf32> to vector<16x16x128xf32>
    %c0_47 = arith.constant 0 : index
    %c0_48 = arith.constant 0 : index
    %c0_49 = arith.constant 0 : index
    %c0_50 = arith.constant 0 : index
    %61 = vector.load %arg4[%c0_47, %c0_48, %c0_49, %c0_50] : memref<1x16x16x128xf32, #tpu.memory_space<vmem>>, vector<1x16x16x128xf32>
    %62 = vector.shape_cast %61 : vector<1x16x16x128xf32> to vector<16x16x128xf32>
    %63 = vector.shape_cast %60 : vector<16x16x128xf32> to vector<1x16x16x128xf32>
    tpu.vector_store %arg4[%c0_47, %c0_48, %c0_49, %c0_50], %63 {strides = array<i32>} : memref<1x16x16x128xf32, #tpu.memory_space<vmem>>, vector<1x16x16x128xf32>,
    %cst_51 = arith.constant dense<0.000000e+00> : vector<128xf32>
    %64 = vector.multi_reduction <add>, %59, %cst_51 [0] : vector<256x128xf32> to vector<128xf32>
    %65 = vector.shape_cast %64 : vector<128xf32> to vector<1x128xf32>
    %66 = arith.mulf %59, %59 : vector<256x128xf32>
    %cst_52 = arith.constant dense<0.000000e+00> : vector<128xf32>
    %67 = vector.multi_reduction <add>, %66, %cst_52 [0] : vector<256x128xf32> to vector<128xf32>
    %68 = vector.shape_cast %67 : vector<128xf32> to vector<1x128xf32>
    %69 = tpu.concatenate %65, %68 in 0 : vector<1x128xf32>, vector<1x128xf32> -> vector<2x128xf32>
    %c0_53 = arith.constant 0 : index
    %c0_54 = arith.constant 0 : index
    %c0_55 = arith.constant 0 : index
    %c0_56 = arith.constant 0 : index
    %70 = vector.load %arg5[%c0_53, %c0_54, %c0_55, %c0_56] : memref<1x1x2x128xf32, #tpu.memory_space<vmem>>, vector<1x1x2x128xf32>
    %71 = vector.shape_cast %70 : vector<1x1x2x128xf32> to vector<2x128xf32>
    %72 = vector.shape_cast %69 : vector<2x128xf32> to vector<1x1x2x128xf32>
    tpu.vector_store %arg5[%c0_53, %c0_54, %c0_55, %c0_56], %72 {strides = array<i32>} : memref<1x1x2x128xf32, #tpu.memory_space<vmem>>, vector<1x1x2x128xf32>,
    return
  }
  func.func @transform_0(%arg0: i32, %arg1: i32) -> (i32, i32, i32, i32, i32) {
    %c0_i32 = arith.constant 0 : i32
    %c0_i32_0 = arith.constant 0 : i32
    %c0_i32_1 = arith.constant 0 : i32
    %c0_i32_2 = arith.constant 0 : i32
    return %arg0, %arg1, %c0_i32, %c0_i32_0, %c0_i32_1 : i32, i32, i32, i32, i32
  }
  func.func @transform_1(%arg0: i32, %arg1: i32) -> (i32, i32, i32, i32) {
    %c0_i32 = arith.constant 0 : i32
    %c0_i32_0 = arith.constant 0 : i32
    %c0_i32_1 = arith.constant 0 : i32
    %c0_i32_2 = arith.constant 0 : i32
    %c0_i32_3 = arith.constant 0 : i32
    return %c0_i32, %c0_i32_0, %c0_i32_1, %c0_i32_2 : i32, i32, i32, i32
  }
  func.func @transform_2(%arg0: i32, %arg1: i32) -> (i32, i32, i32, i32) {
    %c0_i32 = arith.constant 0 : i32
    %c0_i32_0 = arith.constant 0 : i32
    %c0_i32_1 = arith.constant 0 : i32
    return %arg0, %arg1, %c0_i32, %c0_i32_0 : i32, i32, i32, i32
  }
  func.func @transform_3(%arg0: i32, %arg1: i32) -> (i32, i32, i32, i32) {
    %c0_i32 = arith.constant 0 : i32
    %c0_i32_0 = arith.constant 0 : i32
    %c0_i32_1 = arith.constant 0 : i32
    return %arg0, %arg1, %c0_i32, %c0_i32_0 : i32, i32, i32, i32
  }
}

</mosaic_0001>

<bundles_post_ra>
// kernel: tpu_custom_call.1
= control target key start
LH: loop header
LB: loop body
LE: loop exit
PB: predicated region body
PF: predicated region fallthrough
CT: control target
= control target key end

     0   :  { %9 = vsyncpa [#allocation3], 0  ;;  %s4962_s0 = inlined_call_operand.vmem [shape: bf16[2,1,18,18,128], index: 0, kind: input, shape index: {}]   ;;  %s4963_s1 = inlined_call_operand.vmem [shape: bf16[3,3,128,128], index: 1, kind: input, shape index: {}]   ;;  %s4964_s2 = inlined_call_operand.hbm [shape: f32[2,16,16,128], index: 2, kind: output, shape index: {0}]   ;;  %s4965_s3 = inlined_call_operand.hbm [shape: f32[2,1,2,128], index: 3, kind: output, shape index: {1}]  }
   0x1   :  { %11 = vsyncpa [#allocation3 + $0x1], 0 }
   0x2   :  { %12 = vsyncpa [#allocation5], 0 }
   0x3   :  { %14 = vsyncpa [#allocation5 + $0x1], 0  ;;  %s3892_s12 = smov 0   ;;  %s3894_s13 = smov 0  }
   0x4   :  { %s3896_s14 = smov 0   ;;  %s3898_s15 = smov 0  }
   0x5   :  { %s3900_s16 = smov 0   ;;  %s3902_s17 = smov 0  }
   0x6 LB: > { %s3004_s18 = sadd.s32 4294967295, %s3868_s17   ;;  %s3005_s19 = sadd.s32 4294967294, %s3868_s17   ;;  %s3868_s17 = sphi %s3902_s17, %s20_s17   ;;  %s3864_s16 = sphi %s3900_s16, %s5011_s16   ;;  %s3860_s15 = sphi %s3898_s15, %s5010_s15   ;;  %s3856_s14 = sphi %s3896_s14, %s5009_s14   ;;  %s3852_s13 = sphi %s3894_s13, %s5008_s13   ;;  %s3848_s12 = sphi %s3892_s12, %s5007_s12  }
   0x7   : > { %s32_s20 = sadd.s32 1, %s3864_s16  ;;  %s90_s21 = sadd.s32 1, %s3856_s14 }
   0x8   : > { %p34_p0 = scmp.ge.s32.totalorder %s32_s20, 2  ;;  %p100_p1 = scmp.ne.s32.totalorder %s3856_s14, %s3852_s13 }
   0x9   : > { %p101_p2 = scmp.eq.s32.totalorder %s3004_s18, 1  ;;  %p106_p3 = scmp.ne.s32.totalorder %s3852_s13, %s3848_s12 }
   0xa   : > { %s5013_s20 = smov (%p34_p0, %s32_s20), 0  ;;  %p107_p5 = scmp.eq.s32.totalorder %s3005_s19, 1 }
   0xb   : > { %p3932_p4 = por %p101_p2, %p100_p1  ;;  %s85_s23 = ssub.s32 %s3864_s16, %s5013_s20 }
   0xc   : > { %p3008_p6 = scmp.ge.s32.totalorder %s3868_s17, 1  ;;  %p88_p7 = scmp.eq.s32.totalorder %s85_s23, 0 }
   0xd   : > { %p3939_p8 = por %p107_p5, %p106_p3  ;;  %p168_p9 = scmp.lt.s32.totalorder %s3868_s17, 3 }
   0xe   : > { %s3945_s25 = scalar_select %p88_p7, %s3856_s14, %s90_s21  }
   0xf   : > { %p169_p10 = pnand %p3008_p6, %p168_p9 }
  0x11   : > { %172 = sbr.rel (%p169_p10) target bundleno = 780 (0x30c), region = 28 }
  0x16   : > { %v3558_v0 = vld [vmem:[%s4963_s1 + $0xf8] sm:$0xff]  ;;  %v3557_v1 = vld [vmem:[%s4963_s1 + $0xf0] sm:$0xff]  ;;  %v3556_v2 = vld [vmem:[%s4963_s1 + $0xe8] sm:$0xff]  ;;  %p201_p11 = scmp.lt.s32.totalorder %s3860_s15, 1  ;;  %vm866_vm0 = vsmask.f32 3328 }
  0x17   : > { %3616 = vmatpush.bf16.msra.mxu1 %v3558_v0  ;;  %3617 = vmatpush.bf16.msra.mxu2 %v3558_v0  ;;  %v3555_v3 = vld [vmem:[%s4963_s1 + $0xe0] sm:$0xff]  ;;  %v3554_v4 = vld [vmem:[%s4963_s1 + $0xd8] sm:$0xff]  ;;  %v3553_v5 = vld [vmem:[%s4963_s1 + $0xd0] sm:$0xff]  ;;  %vm867_vm1 = vsmask.f32 7440  ;;  %vm1947_vm3 = vcmask 1042432  }
  0x18   : > { %3618 = vmatpush.bf16.msra.mxu3 %v3558_v0  ;;  %442 = vmatpush.bf16.msra.mxu0 %v3558_v0  ;;  %s202_s11 = scalar_select %p201_p11, %s3860_s15, 1  ;;  %v3552_v6 = vld [vmem:[%s4963_s1 + $0xc8] sm:$0xff]  ;;  %v3551_v7 = vld [vmem:[%s4963_s1 + $0xc0] sm:$0xff]  ;;  %v3566_v8 = vld [vmem:[%s4963_s1 + $0x1b8] sm:$0xff]  ;;  %vm1948_vm4 = vcmask 1046532  }
  0x19   : > { %v3574_v9 = vld [vmem:[%s4963_s1 + $0x78] sm:$0xff]  ;;  %v3565_v16 = vld [vmem:[%s4963_s1 + $0x1b0] sm:$0xff]  ;;  %v3564_v20 = vld [vmem:[%s4963_s1 + $0x1a8] sm:$0xff]  ;;  %s4743_s30 = sand.u32 1, %s3852_s13   ;;  %s3778_s26 = scalar_lea.hbm %s4964_s2, 512 }
  0x1a   : > { %s3640_s21 = smul.u32 216, %s202_s11  ;;  %v3550_v14 = vld [vmem:[%s4963_s1 + $0x38] sm:$0xff]  ;;  %v3573_v17 = vld [vmem:[%s4963_s1 + $0x70] sm:$0xff]  ;;  %v3572_v21 = vld [vmem:[%s4963_s1 + $0x68] sm:$0xff]  ;;  %s3009_s4 = sshll.u32 %s4743_s30, 8 }
  0x1b   : > { %3619 = vmatpush.bf16.msra.mxu1 %v3557_v1  ;;  %3620 = vmatpush.bf16.msra.mxu2 %v3557_v1  ;;  %v3582_v15 = vld [vmem:[%s4963_s1 + $0x138] sm:$0xff]  ;;  %v3549_v18 = vld [vmem:[%s4963_s1 + $0x30] sm:$0xff]  ;;  %v3548_v22 = vld [vmem:[%s4963_s1 + $0x28] sm:$0xff]  ;;  %s4753_s5 = scalar_lea.vmem [#allocation2], %s3009_s4  ;;  %s2850_s11 = scalar_lea.sflag [#allocation3], %s4743_s30 }
  0x1c   : > { %3621 = vmatpush.bf16.msra.mxu3 %v3557_v1  ;;  %443 = vmatpush.bf16.msra.mxu0 %v3557_v1  ;;  %s3976_s29 = scalar_lea.vmem %s4962_s0, %s3640_s21  ;;  %v3581_v19 = vld [vmem:[%s4963_s1 + $0x130] sm:$0xff]  ;;  %v3580_v23 = vld [vmem:[%s4963_s1 + $0x128] sm:$0xff]  ;;  %v3563_v24 = vld [vmem:[%s4963_s1 + $0x1a0] sm:$0xff]  ;;  %s2870_s9 = sshll.u32 %s4753_s5, 4  ;;  %s2871_s9 = int_to_ptr.vmem [resolvable:$true] %s2870_s9 }
  0x1d   : > { %v3985_v10 = vld [vmem:[%s3976_s29 + $0x3c] sm:$0xff]  ;;  %v3988_v11 = vld [vmem:[%s3976_s29 + $0x6c] sm:$0xff]  ;;  %v4101_v48 = vld [vmem:[%s3976_s29 + $0x54] sm:$0xff] }
  0x1e   : > { %v3538_v12 = vld [vmem:[%s3976_s29 + $0x9c] sm:$0xff]  ;;  %v3992_v13 = vld [vmem:[%s3976_s29 + $0xc] sm:$0xff]  ;;  %v4104_v49 = vld [vmem:[%s3976_s29 + $0x84] sm:$0xff] }
  0x1f   : > { %3622 = vmatpush.bf16.msra.mxu1 %v3556_v2  ;;  %3623 = vmatpush.bf16.msra.mxu2 %v3556_v2  ;;  %v3571_v25 = vld [vmem:[%s4963_s1 + $0x60] sm:$0xff]  ;;  %v3562_v28 = vld [vmem:[%s4963_s1 + $0x198] sm:$0xff]  ;;  %v4046_v30 = vld [vmem:[%s3976_s29 + $0x48] sm:$0xff] }
  0x20   : > { %3624 = vmatpush.bf16.msra.mxu3 %v3556_v2  ;;  %444 = vmatpush.bf16.msra.mxu0 %v3556_v2  ;;  %v3547_v26 = vld [vmem:[%s4963_s1 + $0x20] sm:$0xff]  ;;  %v3570_v29 = vld [vmem:[%s4963_s1 + $0x58] sm:$0xff]  ;;  %v3539_v32 = vld [vmem:[%s3976_s29 + $0xa8] sm:$0xff] }
  0x21   : > { %v3579_v27 = vld [vmem:[%s4963_s1 + $0x120] sm:$0xff]  ;;  %v4049_v31 = vld [vmem:[%s3976_s29 + $0x78] sm:$0xff]  ;;  %v3561_v36 = vld [vmem:[%s4963_s1 + $0x190] sm:$0xff] }
  0x22   : > { %v4053_v33 = vld [vmem:[%s3976_s29 + $0x18] sm:$0xff]  ;;  %v3569_v37 = vld [vmem:[%s4963_s1 + $0x50] sm:$0xff]  ;;  %v3560_v40 = vld [vmem:[%s4963_s1 + $0x188] sm:$0xff] }
  0x23   : > { %3625 = vmatpush.bf16.msra.mxu1 %v3555_v3  ;;  %3626 = vmatpush.bf16.msra.mxu2 %v3555_v3  ;;  %v3546_v34 = vld [vmem:[%s4963_s1 + $0x18] sm:$0xff]  ;;  %v3545_v38 = vld [vmem:[%s4963_s1 + $0x10] sm:$0xff]  ;;  %v3568_v41 = vld [vmem:[%s4963_s1 + $0x48] sm:$0xff] }
  0x24   : > { %3627 = vmatpush.bf16.msra.mxu3 %v3555_v3  ;;  %445 = vmatpush.bf16.msra.mxu0 %v3555_v3  ;;  %v3578_v35 = vld [vmem:[%s4963_s1 + $0x118] sm:$0xff]  ;;  %v3577_v39 = vld [vmem:[%s4963_s1 + $0x110] sm:$0xff]  ;;  %v3544_v42 = vld [vmem:[%s4963_s1 + $0x8] sm:$0xff] }
  0x25   : > { %v3576_v43 = vld [vmem:[%s4963_s1 + $0x108] sm:$0xff]  ;;  %v3559_v44 = vld [vmem:[%s4963_s1 + $0x180] sm:$0xff]  ;;  %v3540_v50 = vld [vmem:[%s3976_s29 + $0xb4] sm:$0xff] }
  0x26   : > { %v3567_v45 = vld [vmem:[%s4963_s1 + $0x40] sm:$0xff]  ;;  %v3598_v54 = vld [vmem:[%s4963_s1 + $0xb8] sm:$0xff]  ;;  %v214_v57 = vld [vmem:[%s3976_s29 + $0xc] sm:$0xf] }
  0x27   : > { %3628 = vmatpush.bf16.msra.mxu1 %v3554_v4  ;;  %3629 = vmatpush.bf16.msra.mxu2 %v3554_v4  ;;  %v3543_v46 = vld [vmem:[%s4963_s1] sm:$0xff]  ;;  %v3606_v55 = vld [vmem:[%s4963_s1 + $0x178] sm:$0xff]  ;;  %v215_v58 = vld [vmem:[%s3976_s29 + $0x10] sm:$0xf]  ;;  %v894_v0 = vshrl.u32 %v214_v57, 16  ;;  %v897_v1 = vshll.u32 %v214_v57, 16 }
  0x28   : > { %3630 = vmatpush.bf16.msra.mxu3 %v3554_v4  ;;  %446 = vmatpush.bf16.msra.mxu0 %v3554_v4  ;;  %v3575_v47 = vld [vmem:[%s4963_s1 + $0x100] sm:$0xff]  ;;  %v3590_v56 = vld [vmem:[%s4963_s1 + $0x1f8] sm:$0xff]  ;;  %v903_v2 = vshll.u32 %v215_v58, 16  ;;  %v907_v3 = vshrl.u32 %v215_v58, 16  ;;  %vm4144_vm2 = vmor %vm866_vm0, %vm867_vm1 }
  0x29   : > { %v4108_v51 = vld [vmem:[%s3976_s29 + $0x24] sm:$0xff]  ;;  %v211_v52 = vld [vmem:[%s3976_s29] sm:$0xf]  ;;  %v3614_v59 = vld [vmem:[%s4963_s1 + $0x238] sm:$0xff] }
  0x2a   : > { %v212_v53 = vld [vmem:[%s3976_s29 + $0x4] sm:$0xf]  ;;  %v870_v60 = vshrl.u32 %v211_v52, 16  ;;  %v873_v61 = vshll.u32 %v211_v52, 16  ;;  %v219_v58 = vld [vmem:[%s3976_s29 + $0x20] sm:$0x1]  ;;  %vm4538_vm5 = vmor %vm1947_vm3, %vm1948_vm4 }
  0x2b   : > { %3631 = vmatpush.bf16.msra.mxu1 %v3553_v5  ;;  %3632 = vmatpush.bf16.msra.mxu2 %v3553_v5  ;;  %v879_v62 = vshll.u32 %v212_v53, 16  ;;  %v883_v63 = vshrl.u32 %v212_v53, 16 }
  0x2c   : > { %3633 = vmatpush.bf16.msra.mxu3 %v3553_v5  ;;  %447 = vmatpush.bf16.msra.mxu0 %v3553_v5  ;;  %v872_v4 = vrot.slane %v870_v60, 4  ;;  %v875_v5 = vrot.slane %v873_v61, 5 }
  0x2f   : > { %3634 = vmatpush.bf16.msra.mxu1 %v3552_v6  ;;  %3635 = vmatpush.bf16.msra.mxu2 %v3552_v6 }
  0x30   : > { %3636 = vmatpush.bf16.msra.mxu3 %v3552_v6  ;;  %448 = vmatpush.bf16.msra.mxu0 %v3552_v6  ;;  %v881_v6 = vrot.slane %v879_v62, 5 }
  0x33   : > { %3637 = vmatpush.bf16.msra.mxu1 %v3551_v7  ;;  %3638 = vmatpush.bf16.msra.mxu2 %v3551_v7 }
  0x34   : > { %3639 = vmatpush.bf16.msra.mxu3 %v3551_v7  ;;  %449 = vmatpush.bf16.msra.mxu0 %v3551_v7  ;;  %v885_v7 = vrot.slane %v883_v63, 4 }
  0x36   : > { %470 = vmatmul.bf16.vlgmr.msra.gmra.mxu1 %v3985_v10  ;;  %490 = vmatmul.bf16.vlgmr.msra.gmra.mxu2 %v3988_v11 }
  0x37   : > { %745 = vmatpush.bf16.msrb.mxu2 %v3566_v8  ;;  %510 = vmatmul.bf16.vlgmr.msra.gmra.mxu3 %v3538_v12  ;;  %v213_v8 = vld [vmem:[%s3976_s29 + $0x8] sm:$0x1]  ;;  %v899_v12 = vrot.slane %v897_v1, 5  ;;  %v220_v1 = vld [vmem:[%s3976_s29 + $0x24] sm:$0xf] }
  0x38   : > { %1382 = vmatpush.bf16.msrb.mxu3 %v3574_v9  ;;  %450 = vmatmul.bf16.vlgmr.msra.gmra.mxu0 %v3992_v13  ;;  %v896_v9 = vrot.slane %v894_v0, 4  ;;  %v937_v0 = vshll.u32 %v219_v58, 16 }
  0x39   : > { %585 = vmatpush.bf16.msrb.mxu1 %v3550_v14  ;;  %1596 = vmatpush.bf16.msrb.mxu0 %v3582_v15  ;;  %v905_v14 = vrot.slane %v903_v2, 5  ;;  %v909_v15 = vrot.slane %v907_v3, 4  ;;  %v221_v2 = vld [vmem:[%s3976_s29 + $0x28] sm:$0xf]  ;;  %v3597_v3 = vld [vmem:[%s4963_s1 + $0xb0] sm:$0xff] }
  0x3b   : > { %746 = vmatpush.bf16.msrb.mxu2 %v3565_v16  ;;  %v216_v16 = vld [vmem:[%s3976_s29 + $0x14] sm:$0x1] }
  0x3c   : > { %1383 = vmatpush.bf16.msrb.mxu3 %v3573_v17  ;;  %v4132_v17 = vld [vmem:[%s3976_s29 + $0x60] sm:$0xff] }
  0x3d   : > { %586 = vmatpush.bf16.msrb.mxu1 %v3549_v18  ;;  %1597 = vmatpush.bf16.msrb.mxu0 %v3581_v19  ;;  %v4135_v18 = vld [vmem:[%s3976_s29 + $0x90] sm:$0xff]  ;;  %v876_v19 = vor.u32 %v875_v5, %v872_v4 }
  0x3e   : > { %v3605_v4 = vld [vmem:[%s4963_s1 + $0x170] sm:$0xff] }
  0x3f   : > { %747 = vmatpush.bf16.msrb.mxu2 %v3564_v20  ;;  %v889_v20 = vshll.u32 %v213_v8, 16  ;;  %v3589_v5 = vld [vmem:[%s4963_s1 + $0x1f0] sm:$0xff]  ;;  %v939_v8 = vrot.slane %v937_v0, 5  ;;  %v3596_v0 = vld [vmem:[%s4963_s1 + $0xa8] sm:$0xff] }
  0x40   : > { %1384 = vmatpush.bf16.msrb.mxu3 %v3572_v21  ;;  %v3541_v21 = vld [vmem:[%s3976_s29 + $0xc0] sm:$0xff] }
  0x41   : > { %587 = vmatpush.bf16.msrb.mxu1 %v3548_v22  ;;  %1598 = vmatpush.bf16.msrb.mxu0 %v3580_v23  ;;  %v4139_v22 = vld [vmem:[%s3976_s29 + $0x30] sm:$0xff]  ;;  %v886_v23 = vor.u32 %v885_v7, %v881_v6 }
  0x43   : > { %748 = vmatpush.bf16.msrb.mxu2 %v3563_v24  ;;  %v900_v24 = vor.u32 %v899_v12, %v896_v9  ;;  %v3613_v9 = vld [vmem:[%s4963_s1 + $0x230] sm:$0xff]  ;;  %v942_v12 = vshrl.u32 %v220_v1, 16 }
  0x44   : > { %1385 = vmatpush.bf16.msrb.mxu3 %v3571_v25  ;;  %v910_v25 = vor.u32 %v909_v15, %v905_v14  ;;  %v951_v15 = vshll.u32 %v221_v2, 16 }
  0x45   : > { %588 = vmatpush.bf16.msrb.mxu1 %v3547_v26  ;;  %1599 = vmatpush.bf16.msrb.mxu0 %v3579_v27  ;;  %v913_v26 = vshll.u32 %v216_v16, 16  ;;  %v877_v27 = vrot.slane %v876_v19, 4  ;;  %v955_v16 = vshrl.u32 %v221_v2, 16  ;;  %v226_v2 = vld [vmem:[%s3976_s29 + $0x3c] sm:$0xf] }
  0x46   : > { %475 = vmatmul.bf16.gmra.mxu1 %v4046_v30  ;;  %495 = vmatmul.bf16.gmra.mxu2 %v4049_v31 }
  0x47   : > { %749 = vmatpush.bf16.msrb.mxu2 %v3562_v28  ;;  %515 = vmatmul.bf16.gmra.mxu3 %v3539_v32  ;;  %v891_v28 = vrot.slane %v889_v20, 5  ;;  %v901_v32 = vrot.slane %v900_v24, 4  ;;  %v953_v24 = vrot.slane %v951_v15, 5 }
  0x48   : > { %1386 = vmatpush.bf16.msrb.mxu3 %v3570_v29  ;;  %455 = vmatmul.bf16.gmra.mxu0 %v4053_v33  ;;  %v887_v29 = vrot.slane %v886_v23, 4 }
  0x49   : > { %589 = vmatpush.bf16.msrb.mxu1 %v3546_v34  ;;  %1600 = vmatpush.bf16.msrb.mxu0 %v3578_v35  ;;  %v911_v34 = vrot.slane %v910_v25, 4  ;;  %v915_v35 = vrot.slane %v913_v26, 5  ;;  %v957_v25 = vrot.slane %v955_v16, 4 }
  0x4b   : > { %750 = vmatpush.bf16.msrb.mxu2 %v3561_v36 }
  0x4c   : > { %1387 = vmatpush.bf16.msrb.mxu3 %v3569_v37  ;;  %v217_v37 = vld [vmem:[%s3976_s29 + $0x18] sm:$0xf] }
  0x4d   : > { %590 = vmatpush.bf16.msrb.mxu1 %v3545_v38  ;;  %1601 = vmatpush.bf16.msrb.mxu0 %v3577_v39  ;;  %v218_v38 = vld [vmem:[%s3976_s29 + $0x1c] sm:$0xf]  ;;  %v882_v39 = vsel %vm4144_vm2, %v877_v27, %v881_v6 }
  0x4f   : > { %751 = vmatpush.bf16.msrb.mxu2 %v3560_v40  ;;  %v892_v40 = vsel %vm4144_vm2, %v887_v29, %v891_v28  ;;  %v222_v28 = vld [vmem:[%s3976_s29 + $0x2c] sm:$0x1] }
  0x50   : > { %1388 = vmatpush.bf16.msrb.mxu3 %v3568_v41  ;;  %v906_v41 = vsel %vm4144_vm2, %v901_v32, %v905_v14  ;;  %v945_v14 = vshll.u32 %v220_v1, 16  ;;  %v958_v32 = vor.u32 %v957_v25, %v953_v24  ;;  %v3604_v1 = vld [vmem:[%s4963_s1 + $0x168] sm:$0xff] }
  0x51   : > { %591 = vmatpush.bf16.msrb.mxu1 %v3544_v42  ;;  %1602 = vmatpush.bf16.msrb.mxu0 %v3576_v43  ;;  %v916_v42 = vsel %vm4144_vm2, %v911_v34, %v915_v35  ;;  %v918_v43 = vshrl.u32 %v217_v37, 16  ;;  %v1272_v52 = vunpack.c.l.b16 %v906_v41  ;;  %v961_v34 = vshll.u32 %v222_v28, 16  ;;  %v224_v41 = vld [vmem:[%s3976_s29 + $0x34] sm:$0xf]  ;;  %v229_v28 = vld [vmem:[%s3976_s29 + $0x48] sm:$0xf] }
  0x52   : > { %v1273_v53 = vunpack.c.l.b16 %v916_v42  ;;  %v947_v23 = vrot.slane %v945_v14, 5 }
  0x53   : > { %752 = vmatpush.bf16.msrb.mxu2 %v3559_v44  ;;  %v921_v44 = vshll.u32 %v217_v37, 16 }
  0x54   : > { %1389 = vmatpush.bf16.msrb.mxu3 %v3567_v45  ;;  %v927_v45 = vshll.u32 %v218_v38, 16  ;;  %v1303_v61 = vpack.c.b16 %v1273_v53, %v1272_v52 }
  0x55   : > { %592 = vmatpush.bf16.msrb.mxu1 %v3543_v46  ;;  %1603 = vmatpush.bf16.msrb.mxu0 %v3575_v47  ;;  %v931_v46 = vshrl.u32 %v218_v38, 16  ;;  %v1270_v47 = vunpack.c.l.b16 %v882_v39  ;;  %v959_v38 = vrot.slane %v958_v32, 4  ;;  %v963_v39 = vrot.slane %v961_v34, 5 }
  0x56   : > { %480 = vmatmul.bf16.gmra.mxu1 %v4101_v48  ;;  %500 = vmatmul.bf16.gmra.mxu2 %v4104_v49 }
  0x57   : > { %520 = vmatmul.bf16.gmra.mxu3 %v3540_v50  ;;  %2191 = vmatpush.bf16.msra.mxu2 %v3598_v54  ;;  %v1271_v50 = vunpack.c.l.b16 %v892_v40  ;;  %v920_v54 = vrot.slane %v918_v43, 4  ;;  %v933_v57 = vrot.slane %v931_v46, 4  ;;  %v223_v40 = vld [vmem:[%s3976_s29 + $0x30] sm:$0xf]  ;;  %v964_v43 = vsel %vm4144_vm2, %v959_v38, %v963_v39 }
  0x58   : > { %460 = vmatmul.bf16.gmra.mxu0 %v4108_v51  ;;  %2389 = vmatpush.bf16.msra.mxu3 %v3606_v55  ;;  %v923_v55 = vrot.slane %v921_v44, 5  ;;  %v966_v44 = vshrl.u32 %v223_v40, 16  ;;  %v979_v46 = vshrl.u32 %v224_v41, 16  ;;  %v1014_v38 = vshrl.u32 %v229_v28, 16 }
  0x59   : > { %1810 = vmatpush.bf16.msra.mxu1 %v3590_v56  ;;  %2587 = vmatpush.bf16.msra.mxu0 %v3614_v59  ;;  %v929_v56 = vrot.slane %v927_v45, 5  ;;  %v3525_v59 = vld [vmem:[%s3976_s29] sm:$0xff]  ;;  %v1302_v60 = vpack.c.b16 %v1271_v50, %v1270_v47  ;;  %v969_v45 = vshll.u32 %v223_v40, 16  ;;  %v1277_v50 = vunpack.c.l.b16 %v964_v43 }
  0x5a   : > { %v924_v62 = vor.u32 %v923_v55, %v920_v54  ;;  %v968_v52 = vrot.slane %v966_v44, 4  ;;  %v981_v55 = vrot.slane %v979_v46, 4  ;;  %v1017_v39 = vshll.u32 %v229_v28, 16 }
  0x5b   : > { %v934_v63 = vor.u32 %v933_v57, %v929_v56  ;;  %2192 = vmatpush.bf16.msra.mxu2 %v3597_v3  ;;  %v971_v53 = vrot.slane %v969_v45, 5  ;;  %v3588_v3 = vld [vmem:[%s4963_s1 + $0x1e8] sm:$0xff]  ;;  %v1016_v43 = vrot.slane %v1014_v38, 4 }
  0x5c   : > { %v925_v6 = vrot.slane %v924_v62, 4  ;;  %2390 = vmatpush.bf16.msra.mxu3 %v3605_v4  ;;  %v1019_v44 = vrot.slane %v1017_v39, 5 }
  0x5d   : > { %v935_v7 = vrot.slane %v934_v63, 4  ;;  %1811 = vmatpush.bf16.msra.mxu1 %v3589_v5  ;;  %2588 = vmatpush.bf16.msra.mxu0 %v3613_v9  ;;  %v972_v58 = vor.u32 %v971_v53, %v968_v52 }
  0x5e   : > { %v930_v19 = vsel %vm4144_vm2, %v925_v6, %v929_v56  ;;  %v225_v56 = vld [vmem:[%s3976_s29 + $0x38] sm:$0x1]  ;;  %v990_v6 = vshrl.u32 %v226_v2, 16  ;;  %v1020_v52 = vor.u32 %v1019_v44, %v1016_v43  ;;  %v236_v43 = vld [vmem:[%s3976_s29 + $0x64] sm:$0xf] }
  0x5f   : > { %v940_v20 = vsel %vm4144_vm2, %v935_v7, %v939_v8  ;;  %v1274_v26 = vunpack.c.l.b16 %v930_v19  ;;  %2193 = vmatpush.bf16.msra.mxu2 %v3596_v0  ;;  %v993_v7 = vshll.u32 %v226_v2, 16  ;;  %v232_v0 = vld [vmem:[%s3976_s29 + $0x54] sm:$0xf] }
  0x60   : > { %v1275_v27 = vunpack.c.l.b16 %v940_v20  ;;  %2391 = vmatpush.bf16.msra.mxu3 %v3604_v1  ;;  %v992_v16 = vrot.slane %v990_v6, 4  ;;  %v233_v1 = vld [vmem:[%s3976_s29 + $0x58] sm:$0xf]  ;;  %v1038_v6 = vshrl.u32 %v232_v0, 16 }
  0x61   : > { %1812 = vmatpush.bf16.msra.mxu1 %v3588_v3  ;;  %v995_v19 = vrot.slane %v993_v7, 5  ;;  %v1041_v7 = vshll.u32 %v232_v0, 16 }
  0x62   : > { %v4180_v35 = vpack.c.b16 %v1275_v27, %v1274_v26 }
  0x63   : > { %v996_v25 = vor.u32 %v995_v19, %v992_v16  ;;  %v1040_v19 = vrot.slane %v1038_v6, 4 }
  0x65   : > { %v997_v32 = vrot.slane %v996_v25, 4  ;;  %v234_v25 = vld [vmem:[%s3976_s29 + $0x5c] sm:$0x1] }
  0x66   : > { %485 = vmatmul.bf16.gmra.mxu1 %v4132_v17  ;;  %505 = vmatmul.bf16.gmra.mxu2 %v4135_v18 }
  0x67   : > { %525 = vmatmul.bf16.gmra.mxu3 %v3541_v21  ;;  %v944_v21 = vrot.slane %v942_v12, 4  ;;  %v3612_v12 = vld [vmem:[%s4963_s1 + $0x228] sm:$0xff] }
  0x68   : > { %465 = vmatmul.bf16.gmra.mxu0 %v4139_v22 }
  0x69   : > { %v948_v29 = vor.u32 %v947_v23, %v944_v21  ;;  %2589 = vmatpush.bf16.msra.mxu0 %v3612_v12  ;;  %v228_v23 = vld [vmem:[%s3976_s29 + $0x44] sm:$0x1] }
  0x6a   : > { %v1009_v27 = vshll.u32 %v228_v23, 16 }
  0x6b   : > { %v949_v37 = vrot.slane %v948_v29, 4  ;;  %v230_v29 = vld [vmem:[%s3976_s29 + $0x4c] sm:$0xf] }
  0x6c   : > { %v1023_v40 = vshll.u32 %v230_v29, 16 }
  0x6d   : > { %v954_v42 = vsel %vm4144_vm2, %v949_v37, %v953_v24  ;;  %v1011_v37 = vrot.slane %v1009_v27, 5 }
  0x6e   : > { %v1276_v47 = vunpack.c.l.b16 %v954_v42  ;;  %v1025_v45 = vrot.slane %v1023_v40, 5 }
  0x70   : > { %v4192_v57 = vpack.c.b16 %v1277_v50, %v1276_v47  ;;  %v231_v50 = vld [vmem:[%s3976_s29 + $0x50] sm:$0x1] }
  0x76   : > { %593 = vmatmul.bf16.vlgmr.msrb.gmra.mxu1 %v3525_v59  ;;  %753 = vmatmul.bf16.vlgmr.msrb.gmra.mxu2 %v4053_v33 }
  0x77   : > { %1390 = vmatmul.bf16.vlgmr.msrb.gmra.mxu3 %v1302_v60  ;;  %v985_v60 = vshll.u32 %v225_v56, 16 }
  0x78   : > { %1604 = vmatmul.bf16.vlgmr.msrb.gmra.mxu0 %v1303_v61 }
  0x79   : > { %v987_v63 = vrot.slane %v985_v60, 5 }
  0x86   : > { %598 = vmatmul.bf16.gmra.mxu1 %v3992_v13  ;;  %758 = vmatmul.bf16.gmra.mxu2 %v4108_v51  ;;  %v975_v13 = vshll.u32 %v224_v41, 16  ;;  %v1027_v41 = vshrl.u32 %v230_v29, 16 }
  0x87   : > { %1395 = vmatmul.bf16.gmra.mxu3 %v1303_v61  ;;  %v973_v61 = vrot.slane %v972_v58, 4 }
  0x88   : > { %1609 = vmatmul.bf16.gmra.mxu0 %v4180_v35  ;;  %v977_v54 = vrot.slane %v975_v13, 5  ;;  %v1029_v13 = vrot.slane %v1027_v41, 4 }
  0x8a   : > { %v982_v59 = vor.u32 %v981_v55, %v977_v54  ;;  %v978_v4 = vsel %vm4144_vm2, %v973_v61, %v977_v54  ;;  %v1030_v53 = vor.u32 %v1029_v13, %v1025_v45  ;;  %v1033_v54 = vshll.u32 %v231_v50, 16 }
  0x8b   : > { %v1278_v14 = vunpack.c.l.b16 %v978_v4  ;;  %v3587_v4 = vld [vmem:[%s4963_s1 + $0x1e0] sm:$0xff] }
  0x8c   : > { %v983_v62 = vrot.slane %v982_v59, 4  ;;  %v1021_v59 = vrot.slane %v1020_v52, 4  ;;  %v1031_v60 = vrot.slane %v1030_v53, 4  ;;  %v1035_v61 = vrot.slane %v1033_v54, 5  ;;  %1813 = vmatpush.bf16.msra.mxu1 %v3587_v4 }
  0x8d   : > { %v1071_v52 = vshll.u32 %v236_v43, 16  ;;  %v1075_v53 = vshrl.u32 %v236_v43, 16 }
  0x8e   : > { %v988_v5 = vsel %vm4144_vm2, %v983_v62, %v987_v63  ;;  %v3595_v62 = vld [vmem:[%s4963_s1 + $0xa0] sm:$0xff]  ;;  %v1036_v3 = vsel %vm4144_vm2, %v1031_v60, %v1035_v61 }
  0x8f   : > { %v1279_v15 = vunpack.c.l.b16 %v988_v5  ;;  %v3603_v63 = vld [vmem:[%s4963_s1 + $0x160] sm:$0xff]  ;;  %2194 = vmatpush.bf16.msra.mxu2 %v3595_v62  ;;  %v1283_v16 = vunpack.c.l.b16 %v1036_v3  ;;  %v1073_v62 = vrot.slane %v1071_v52, 5 }
  0x90   : > { %2392 = vmatpush.bf16.msra.mxu3 %v3603_v63  ;;  %v1077_v63 = vrot.slane %v1075_v53, 4 }
  0x91   : > { %v4217_v24 = vpack.c.b16 %v1279_v15, %v1278_v14  ;;  %v3611_v14 = vld [vmem:[%s4963_s1 + $0x220] sm:$0xff] }
  0x92   : > { %2590 = vmatpush.bf16.msra.mxu0 %v3611_v14  ;;  %v238_v14 = vld [vmem:[%s3976_s29 + $0x6c] sm:$0xf] }
  0x96   : > { %603 = vmatmul.bf16.gmra.mxu1 %v4053_v33  ;;  %763 = vmatmul.bf16.gmra.mxu2 %v4139_v22  ;;  %v227_v33 = vld [vmem:[%s3976_s29 + $0x40] sm:$0xf] }
  0x97   : > { %1400 = vmatmul.bf16.gmra.mxu3 %v4180_v35  ;;  %v999_v8 = vshll.u32 %v227_v33, 16  ;;  %v1003_v9 = vshrl.u32 %v227_v33, 16  ;;  %v1026_v33 = vsel %vm4144_vm2, %v1021_v59, %v1025_v45 }
  0x98   : > { %1614 = vmatmul.bf16.gmra.mxu0 %v4192_v57  ;;  %v1282_v15 = vunpack.c.l.b16 %v1026_v33 }
  0x99   : > { %v1001_v20 = vrot.slane %v999_v8, 5  ;;  %v1005_v21 = vrot.slane %v1003_v9, 4  ;;  %v1047_v8 = vshll.u32 %v233_v1, 16  ;;  %v1051_v9 = vshrl.u32 %v233_v1, 16  ;;  %v237_v1 = vld [vmem:[%s3976_s29 + $0x68] sm:$0x1] }
  0x9a   : > { %v4273_v29 = vpack.c.b16 %v1283_v16, %v1282_v15  ;;  %v3594_v15 = vld [vmem:[%s4963_s1 + $0x98] sm:$0xff]  ;;  %v239_v16 = vld [vmem:[%s3976_s29 + $0x70] sm:$0xf] }
  0x9b   : > { %v1006_v26 = vor.u32 %v1005_v21, %v1001_v20  ;;  %v1002_v42 = vsel %vm4144_vm2, %v997_v32, %v1001_v20  ;;  %v1043_v20 = vrot.slane %v1041_v7, 5  ;;  %v1049_v21 = vrot.slane %v1047_v8, 5  ;;  %2195 = vmatpush.bf16.msra.mxu2 %v3594_v15 }
  0x9c   : > { %v1280_v46 = vunpack.c.l.b16 %v1002_v42  ;;  %v1053_v23 = vrot.slane %v1051_v9, 4  ;;  %v1078_v8 = vor.u32 %v1077_v63, %v1073_v62  ;;  %v1081_v9 = vshll.u32 %v237_v1, 16 }
  0x9d   : > { %v1007_v34 = vrot.slane %v1006_v26, 4  ;;  %v1044_v32 = vor.u32 %v1043_v20, %v1040_v19  ;;  %v3602_v19 = vld [vmem:[%s4963_s1 + $0x158] sm:$0xff] }
  0x9e   : > { %2393 = vmatpush.bf16.msra.mxu3 %v3602_v19 }
  0x9f   : > { %v1045_v39 = vrot.slane %v1044_v32, 4  ;;  %v1086_v32 = vshrl.u32 %v238_v14, 16 }
  0xa6   : > { %608 = vmatmul.bf16.gmra.mxu1 %v4108_v51  ;;  %768 = vmatmul.bf16.gmra.mxu2 %v3985_v10  ;;  %v1012_v51 = vsel %vm4144_vm2, %v1007_v34, %v1011_v37  ;;  %v1054_v34 = vor.u32 %v1053_v23, %v1049_v21  ;;  %v1057_v37 = vshll.u32 %v234_v25, 16  ;;  %v1083_v23 = vrot.slane %v1081_v9, 5 }
  0xa7   : > { %1405 = vmatmul.bf16.gmra.mxu3 %v4192_v57  ;;  %v1281_v47 = vunpack.c.l.b16 %v1012_v51  ;;  %v235_v51 = vld [vmem:[%s3976_s29 + $0x60] sm:$0xf] }
  0xa8   : > { %1619 = vmatmul.bf16.gmra.mxu0 %v4217_v24  ;;  %v1055_v40 = vrot.slane %v1054_v34, 4  ;;  %v1059_v41 = vrot.slane %v1057_v37, 5  ;;  %v1065_v50 = vshll.u32 %v235_v51, 16  ;;  %v1089_v34 = vshll.u32 %v238_v14, 16 }
  0xa9   : > { %v4232_v56 = vpack.c.b16 %v1281_v47, %v1280_v46  ;;  %v1062_v47 = vshrl.u32 %v235_v51, 16  ;;  %v1095_v37 = vshll.u32 %v239_v16, 16 }
  0xaa   : > { %v1060_v13 = vsel %vm4144_vm2, %v1055_v40, %v1059_v41  ;;  %v1067_v61 = vrot.slane %v1065_v50, 5  ;;  %v1091_v50 = vrot.slane %v1089_v34, 5 }
  0xab   : > { %v1285_v59 = vunpack.c.l.b16 %v1060_v13  ;;  %v1064_v60 = vrot.slane %v1062_v47, 4  ;;  %v3610_v13 = vld [vmem:[%s4963_s1 + $0x218] sm:$0xff]  ;;  %v1088_v47 = vrot.slane %v1086_v32, 4  ;;  %v1097_v52 = vrot.slane %v1095_v37, 5 }
  0xac   : > { %2591 = vmatpush.bf16.msra.mxu0 %v3610_v13 }
  0xad   : > { %v1068_v7 = vor.u32 %v1067_v61, %v1064_v60  ;;  %v240_v60 = vld [vmem:[%s3976_s29 + $0x74] sm:$0x1]  ;;  %v1092_v63 = vor.u32 %v1091_v50, %v1088_v47 }
  0xaf   : > { %v1069_v20 = vrot.slane %v1068_v7, 4  ;;  %v1105_v7 = vshll.u32 %v240_v60, 16  ;;  %v1093_v15 = vrot.slane %v1092_v63, 4  ;;  %v243_v63 = vld [vmem:[%s3976_s29 + $0x80] sm:$0x1] }
  0xb1   : > { %v1074_v51 = vsel %vm4144_vm2, %v1069_v20, %v1073_v62  ;;  %v1107_v19 = vrot.slane %v1105_v7, 5  ;;  %v241_v20 = vld [vmem:[%s3976_s29 + $0x78] sm:$0xf]  ;;  %v1098_v34 = vsel %vm4144_vm2, %v1093_v15, %v1097_v52 }
  0xb2   : > { %v1288_v47 = vunpack.c.l.b16 %v1098_v34 }
  0xb3   : > { %v4230_v55 = vpop.f32.mrf.mxu1 }
  0xb5   : > { %v4234_v58 = vpop.f32.mrf.mxu0 }
  0xb6   : > { %613 = vmatmul.bf16.gmra.mxu1 %v4139_v22  ;;  %773 = vmatmul.bf16.gmra.mxu2 %v4046_v30 }
  0xb7   : > { %1410 = vmatmul.bf16.gmra.mxu3 %v4217_v24 }
  0xb8   : > { %1624 = vmatmul.bf16.gmra.mxu0 %v4232_v56 }
  0xb9   : > { %v4248_v22 = vpop.f32.mrf.mxu2 }
  0xba   : > { %v4250_v2 = vpop.f32.mrf.mxu3 }
  0xbb   : > { %v4259_v5 = vpop.f32.mrf.mxu1 }
  0xbd   : > { %v4261_v12 = vpop.f32.mrf.mxu0 }
  0xc1   : > { %v4267_v26 = vpop.f32.mrf.mxu2 }
  0xc2   : > { %v4269_v27 = vpop.f32.mrf.mxu3 }
  0xc3   : > { %v4271_v28 = vpop.f32.mrf.mxu1 }
  0xc5   : > { %v4275_v38 = vpop.f32.mrf.mxu0 }
  0xc6   : > { %618 = vmatmul.bf16.gmra.mxu1 %v3985_v10  ;;  %778 = vmatmul.bf16.gmra.mxu2 %v4101_v48  ;;  %v1050_v10 = vsel %vm4144_vm2, %v1045_v39, %v1049_v21  ;;  %v1079_v21 = vrot.slane %v1078_v8, 4  ;;  %v1099_v39 = vshrl.u32 %v239_v16, 16 }
  0xc7   : > { %1415 = vmatmul.bf16.gmra.mxu3 %v4232_v56  ;;  %v1284_v54 = vunpack.c.l.b16 %v1050_v10  ;;  %v3586_v10 = vld [vmem:[%s4963_s1 + $0x1d8] sm:$0xff] }
  0xc8   : > { %1629 = vmatmul.bf16.gmra.mxu0 %v4273_v29  ;;  %v1084_v43 = vsel %vm4144_vm2, %v1079_v21, %v1083_v23  ;;  %v1101_v53 = vrot.slane %v1099_v39, 4  ;;  %1814 = vmatpush.bf16.msra.mxu1 %v3586_v10  ;;  %v242_v21 = vld [vmem:[%s3976_s29 + $0x7c] sm:$0xf]  ;;  %v1110_v39 = vshrl.u32 %v241_v20, 16 }
  0xc9   : > { %v4281_v42 = vpop.f32.mrf.mxu2  ;;  %v4302_v4 = vpack.c.b16 %v1285_v59, %v1284_v54  ;;  %v1286_v54 = vunpack.c.l.b16 %v1074_v51  ;;  %v1287_v59 = vunpack.c.l.b16 %v1084_v43  ;;  %v1113_v51 = vshll.u32 %v241_v20, 16 }
  0xca   : > { %v4285_v44 = vpop.f32.mrf.mxu3  ;;  %v1102_v1 = vor.u32 %v1101_v53, %v1097_v52  ;;  %v1119_v43 = vshll.u32 %v242_v21, 16  ;;  %v1123_v10 = vshrl.u32 %v242_v21, 16  ;;  %v1112_v53 = vrot.slane %v1110_v39, 4 }
  0xcb   : > { %v4287_v45 = vpop.f32.mrf.mxu1  ;;  %v4343_v9 = vpack.c.b16 %v1287_v59, %v1286_v54  ;;  %v1115_v54 = vrot.slane %v1113_v51, 5  ;;  %v1129_v20 = vshll.u32 %v243_v63, 16 }
  0xcc   : > { %v1103_v16 = vrot.slane %v1102_v1, 4  ;;  %v1121_v59 = vrot.slane %v1119_v43, 5  ;;  %v1125_v60 = vrot.slane %v1123_v10, 4  ;;  %v3593_v43 = vld [vmem:[%s4963_s1 + $0x90] sm:$0xff]  ;;  %v244_v10 = vld [vmem:[%s3976_s29 + $0x84] sm:$0xf] }
  0xcd   : > { %v4293_v46 = vpop.f32.mrf.mxu0  ;;  %4975 = vst [vmem:[#allocation10_spill] sm:$0xff] %v4343_v9  ;;  %v1131_v51 = vrot.slane %v1129_v20, 5  ;;  %2196 = vmatpush.bf16.msra.mxu2 %v3593_v43 }
  0xd1   : > { %v4295_v0 = vpop.f32.mrf.mxu2 }
  0xd2   : > { %v4298_v33 = vpop.f32.mrf.mxu3 }
  0xd3   : > { %v4300_v3 = vpop.f32.mrf.mxu1 }
  0xd5   : > { %v4304_v6 = vpop.f32.mrf.mxu0 }
  0xd6   : > { %623 = vmatmul.bf16.gmra.mxu1 %v4046_v30  ;;  %783 = vmatmul.bf16.gmra.mxu2 %v4132_v17 }
  0xd7   : > { %1420 = vmatmul.bf16.gmra.mxu3 %v4273_v29 }
  0xd8   : > { %1634 = vmatmul.bf16.gmra.mxu0 %v4302_v4 }
  0xd9   : > { %v4318_v30 = vpop.f32.mrf.mxu2 }
  0xda   : > { %v4320_v25 = vpop.f32.mrf.mxu3 }
  0xdb   : > { %4973 = vst [vmem:[#allocation8_spill] sm:$0xff] %v4320_v25  ;;  %v4322_v40 = vpop.f32.mrf.mxu1 }
  0xdd   : > { %v4324_v41 = vpop.f32.mrf.mxu0 }
  0xe1   : > { %v4337_v61 = vpop.f32.mrf.mxu2 }
  0xe2   : > { %v4339_v62 = vpop.f32.mrf.mxu3 }
  0xe3   : > { %4974 = vst [vmem:[#allocation9_spill] sm:$0xff] %v4339_v62  ;;  %v4341_v8 = vpop.f32.mrf.mxu1 }
  0xe5   : > { %v4345_v14 = vpop.f32.mrf.mxu0 }
  0xe6   : > { %628 = vmatmul.bf16.gmra.mxu1 %v4101_v48  ;;  %788 = vmatmul.bf16.gmra.mxu2 %v3988_v11  ;;  %v1108_v48 = vsel %vm4144_vm2, %v1103_v16, %v1107_v19  ;;  %v1116_v16 = vor.u32 %v1115_v54, %v1112_v53  ;;  %v1126_v19 = vor.u32 %v1125_v60, %v1121_v59 }
  0xe7   : > { %1425 = vmatmul.bf16.gmra.mxu3 %v4302_v4  ;;  %v1289_v50 = vunpack.c.l.b16 %v1108_v48 }
  0xe8   : > { %1639 = vmatmul.bf16.gmra.mxu0 %v4343_v9  ;;  %v1117_v48 = vrot.slane %v1116_v16, 4  ;;  %v1127_v39 = vrot.slane %v1126_v19, 4  ;;  %v1137_v16 = vshll.u32 %v244_v10, 16 }
  0xe9   : > { %v4353_v23 = vpop.f32.mrf.mxu2  ;;  %v4370_v15 = vpack.c.b16 %v1289_v50, %v1288_v47 }
  0xea   : > { %v4355_v32 = vpop.f32.mrf.mxu3  ;;  %v1122_v60 = vsel %vm4144_vm2, %v1117_v48, %v1121_v59  ;;  %v1132_v63 = vsel %vm4144_vm2, %v1127_v39, %v1131_v51  ;;  %v3609_v59 = vld [vmem:[%s4963_s1 + $0x210] sm:$0xff] }
  0xeb   : > { %4976 = vst [vmem:[#allocation11_spill] sm:$0xff] %v4355_v32  ;;  %v4361_v37 = vpop.f32.mrf.mxu1  ;;  %2592 = vmatpush.bf16.msra.mxu0 %v3609_v59  ;;  %v1290_v39 = vunpack.c.l.b16 %v1122_v60  ;;  %v1291_v51 = vunpack.c.l.b16 %v1132_v63 }
  0xed   : > { %v4363_v13 = vpop.f32.mrf.mxu0  ;;  %v4399_v25 = vpack.c.b16 %v1291_v51, %v1290_v39 }
  0xf1   : > { %v4366_v1 = vpop.f32.mrf.mxu2 }
  0xf2   : > { %v4368_v52 = vpop.f32.mrf.mxu3 }
  0xf3   : > { %4977 = vst [vmem:[#allocation12_spill] sm:$0xff] %v4368_v52  ;;  %v594_v7 = vpop.f32.mrf.mxu1 }
  0xf4   : > { %v595_v21 = vadd.f32 %v594_v7, %v4234_v58  ;;  %v3601_v58 = vld [vmem:[%s4963_s1 + $0x150] sm:$0xff]  ;;  %v1134_v7 = vshrl.u32 %v244_v10, 16 }
  0xf5   : > { %v1605_v34 = vpop.f32.mrf.mxu0  ;;  %2394 = vmatpush.bf16.msra.mxu3 %v3601_v58 }
  0xf6   : > { %633 = vmatmul.bf16.gmra.mxu1 %v4132_v17  ;;  %793 = vmatmul.bf16.gmra.mxu2 %v4049_v31  ;;  %v245_v17 = vld [vmem:[%s3976_s29 + $0x88] sm:$0xf]  ;;  %v1136_v58 = vrot.slane %v1134_v7, 4 }
  0xf7   : > { %1430 = vmatmul.bf16.gmra.mxu3 %v4343_v9  ;;  %v1143_v32 = vshll.u32 %v245_v17, 16  ;;  %v1147_v43 = vshrl.u32 %v245_v17, 16 }
  0xf8   : > { %1644 = vmatmul.bf16.gmra.mxu0 %v4370_v15 }
  0xf9   : > { %v754_v47 = vpop.f32.mrf.mxu2  ;;  %v1145_v10 = vrot.slane %v1143_v32, 5  ;;  %v247_v32 = vld [vmem:[%s3976_s29 + $0x90] sm:$0xf] }
  0xfa   : > { %v834_v50 = vadd.f32 %v754_v47, %v595_v21  ;;  %v1391_v53 = vpop.f32.mrf.mxu3  ;;  %v3585_v21 = vld [vmem:[%s4963_s1 + $0x1d0] sm:$0xff]  ;;  %v1149_v47 = vrot.slane %v1147_v43, 4 }
  0xfb   : > { %v596_v54 = vpop.f32.mrf.mxu1  ;;  %1815 = vmatpush.bf16.msra.mxu1 %v3585_v21 }
  0xfc   : > { %v1471_v19 = vadd.f32 %v1391_v53, %v834_v50  ;;  %v597_v20 = vadd.f32 %v596_v54, %v4261_v12  ;;  %v1139_v12 = vrot.slane %v1137_v16, 5  ;;  %v246_v50 = vld [vmem:[%s3976_s29 + $0x8c] sm:$0x1]  ;;  %v1150_v60 = vor.u32 %v1149_v47, %v1145_v10  ;;  %v248_v16 = vld [vmem:[%s3976_s29 + $0x94] sm:$0xf] }
  0xfd   : > { %v1607_v52 = vpop.f32.mrf.mxu0  ;;  %v1153_v63 = vshll.u32 %v246_v50, 16 }
  0xfe   : > { %v4396_v48 = vadd.f32 %v1605_v34, %v1471_v19  ;;  %v1140_v9 = vor.u32 %v1139_v12, %v1136_v58  ;;  %v1151_v43 = vrot.slane %v1150_v60, 4  ;;  %v1161_v58 = vshll.u32 %v247_v32, 16 }
  0xff   : > { %v1155_v59 = vrot.slane %v1153_v63, 5  ;;  %v1171_v12 = vshrl.u32 %v248_v16, 16 }
 0x100   : > { %4978 = vst [vmem:[#allocation13_spill] sm:$0xff] %v4396_v48 }
 0x101   : > { %v756_v17 = vpop.f32.mrf.mxu2 }
 0x102   : > { %v835_v53 = vadd.f32 %v756_v17, %v597_v20  ;;  %v1393_v54 = vpop.f32.mrf.mxu3  ;;  %v1141_v20 = vrot.slane %v1140_v9, 4  ;;  %v1156_v9 = vsel %vm4144_vm2, %v1151_v43, %v1155_v59 }
 0x103   : > { %v599_v62 = vpop.f32.mrf.mxu1 }
 0x104   : > { %v1472_v21 = vadd.f32 %v1393_v54, %v835_v53  ;;  %v600_v34 = vadd.f32 %v599_v62, %v4275_v38  ;;  %v1158_v38 = vshrl.u32 %v247_v32, 16  ;;  %v1146_v53 = vsel %vm4144_vm2, %v1141_v20, %v1145_v10 }
 0x105   : > { %v1610_v19 = vpop.f32.mrf.mxu0  ;;  %v1292_v32 = vunpack.c.l.b16 %v1146_v53 }
 0x106   : > { %638 = vmatmul.bf16.gmra.mxu1 %v3988_v11  ;;  %798 = vmatmul.bf16.gmra.mxu2 %v4104_v49  ;;  %v4405_v7 = vadd.f32 %v1607_v52, %v1472_v21  ;;  %v1167_v11 = vshll.u32 %v248_v16, 16  ;;  %v1160_v54 = vrot.slane %v1158_v38, 4  ;;  %v1163_v21 = vrot.slane %v1161_v58, 5  ;;  %v249_v16 = vld [vmem:[%s3976_s29 + $0x98] sm:$0x1] }
 0x107   : > { %1435 = vmatmul.bf16.gmra.mxu3 %v4370_v15  ;;  %v1177_v48 = vshll.u32 %v249_v16, 16 }
 0x108   : > { %4979 = vst [vmem:[#allocation14_spill] sm:$0xff] %v4405_v7  ;;  %1649 = vmatmul.bf16.gmra.mxu0 %v4399_v25  ;;  %v1169_v60 = vrot.slane %v1167_v11, 5 }
 0x109   : > { %v759_v39 = vpop.f32.mrf.mxu2 }
 0x10a   : > { %v836_v62 = vadd.f32 %v759_v39, %v600_v34  ;;  %v1396_v51 = vpop.f32.mrf.mxu3  ;;  %v1173_v34 = vrot.slane %v1171_v12, 4  ;;  %v1293_v39 = vunpack.c.l.b16 %v1156_v9  ;;  %v3592_v12 = vld [vmem:[%s4963_s1 + $0x88] sm:$0xff] }
 0x10b   : > { %v601_v47 = vpop.f32.mrf.mxu1  ;;  %2197 = vmatpush.bf16.msra.mxu2 %v3592_v12 }
 0x10c   : > { %v1473_v17 = vadd.f32 %v1396_v51, %v836_v62  ;;  %v602_v52 = vadd.f32 %v601_v47, %v4293_v46  ;;  %v1164_v46 = vor.u32 %v1163_v21, %v1160_v54  ;;  %v1174_v47 = vor.u32 %v1173_v34, %v1169_v60 }
 0x10d   : > { %v1612_v50 = vpop.f32.mrf.mxu0  ;;  %v4418_v20 = vpack.c.b16 %v1293_v39, %v1292_v32 }
 0x10e   : > { %v4415_v63 = vadd.f32 %v1610_v19, %v1473_v17  ;;  %v1165_v19 = vrot.slane %v1164_v46, 4  ;;  %v1175_v58 = vrot.slane %v1174_v47, 4  ;;  %v251_v17 = vld [vmem:[%s3976_s29 + $0xa0] sm:$0xf]  ;;  %v3584_v46 = vld [vmem:[%s4963_s1 + $0x1c8] sm:$0xff] }
 0x10f   : > { %v1191_v32 = vshll.u32 %v251_v17, 16  ;;  %v1195_v39 = vshrl.u32 %v251_v17, 16  ;;  %1816 = vmatpush.bf16.msra.mxu1 %v3584_v46 }
 0x110   : > { %v1170_v53 = vsel %vm4144_vm2, %v1165_v19, %v1169_v60  ;;  %v3608_v60 = vld [vmem:[%s4963_s1 + $0x208] sm:$0xff] }
 0x111   : > { %v761_v7 = vpop.f32.mrf.mxu2  ;;  %v1294_v47 = vunpack.c.l.b16 %v1170_v53  ;;  %2593 = vmatpush.bf16.msra.mxu0 %v3608_v60  ;;  %v254_v60 = vld [vmem:[%s3976_s29 + $0xac] sm:$0xf] }
 0x112   : > { %v837_v62 = vadd.f32 %v761_v7, %v602_v52  ;;  %v1398_v51 = vpop.f32.mrf.mxu3  ;;  %v1179_v7 = vrot.slane %v1177_v48, 5 }
 0x113   : > { %v604_v10 = vpop.f32.mrf.mxu1 }
 0x114   : > { %v1474_v43 = vadd.f32 %v1398_v51, %v837_v62  ;;  %v605_v59 = vadd.f32 %v604_v10, %v4304_v6  ;;  %v3600_v6 = vld [vmem:[%s4963_s1 + $0x148] sm:$0xff]  ;;  %v1180_v9 = vsel %vm4144_vm2, %v1175_v58, %v1179_v7  ;;  %v1193_v58 = vrot.slane %v1191_v32, 5  ;;  %v252_v7 = vld [vmem:[%s3976_s29 + $0xa4] sm:$0x1] }
 0x115   : > { %v1615_v38 = vpop.f32.mrf.mxu0  ;;  %2395 = vmatpush.bf16.msra.mxu3 %v3600_v6  ;;  %v1295_v10 = vunpack.c.l.b16 %v1180_v9  ;;  %v1201_v53 = vshll.u32 %v252_v7, 16 }
 0x116   : > { %643 = vmatmul.bf16.gmra.mxu1 %v4049_v31  ;;  %803 = vmatmul.bf16.gmra.mxu2 %v4135_v18  ;;  %v4423_v11 = vadd.f32 %v1612_v50, %v1474_v43  ;;  %v250_v31 = vld [vmem:[%s3976_s29 + $0x9c] sm:$0xf] }
 0x117   : > { %1440 = vmatmul.bf16.gmra.mxu3 %v4399_v25  ;;  %v1182_v21 = vshrl.u32 %v250_v31, 16  ;;  %v1185_v34 = vshll.u32 %v250_v31, 16 }
 0x118   : > { %4980 = vst [vmem:[#allocation15_spill] sm:$0xff] %v4423_v11  ;;  %1654 = vmatmul.bf16.gmra.mxu0 %v4418_v20  ;;  %v3714_v11 = vld [vmem:[%s3976_s29 + $0x20] sm:$0x1] }
 0x119   : > { %v764_v52 = vpop.f32.mrf.mxu2  ;;  %v1187_v19 = vrot.slane %v1185_v34, 5 }
 0x11a   : > { %v838_v48 = vadd.f32 %v764_v52, %v605_v59  ;;  %v1401_v50 = vpop.f32.mrf.mxu3  ;;  %v1184_v59 = vrot.slane %v1182_v21, 4  ;;  %v4449_v52 = vpack.c.b16 %v1295_v10, %v1294_v47  ;;  %v4454_v21 = vld [vmem:[%s3976_s29 + $0x9c] sm:$0xff] }
 0x11b   : > { %v606_v54 = vpop.f32.mrf.mxu1 }
 0x11c   : > { %v1475_v16 = vadd.f32 %v1401_v50, %v838_v48  ;;  %v607_v62 = vadd.f32 %v606_v54, %v4324_v41  ;;  %v1197_v41 = vrot.slane %v1195_v39, 4  ;;  %4982 = vst [vmem:[#allocation17_spill] sm:$0xff] %v4449_v52  ;;  %v1188_v48 = vor.u32 %v1187_v19, %v1184_v59 }
 0x11d   : > { %v1617_v51 = vpop.f32.mrf.mxu0 }
 0x11e   : > { %v4446_v43 = vadd.f32 %v1615_v38, %v1475_v16  ;;  %v1198_v50 = vor.u32 %v1197_v41, %v1193_v58  ;;  %v1189_v32 = vrot.slane %v1188_v48, 4  ;;  %v1203_v16 = vrot.slane %v1201_v53, 5 }
 0x120   : > { %4981 = vst [vmem:[#allocation16_spill] sm:$0xff] %v4446_v43  ;;  %v1199_v39 = vrot.slane %v1198_v50, 4 }
 0x121   : > { %v766_v12 = vpop.f32.mrf.mxu2 }
 0x122   : > { %v839_v6 = vadd.f32 %v766_v12, %v607_v62  ;;  %v1403_v31 = vpop.f32.mrf.mxu3  ;;  %v253_v62 = vld [vmem:[%s3976_s29 + $0xa8] sm:$0xf] }
 0x123   : > { %v609_v17 = vpop.f32.mrf.mxu1  ;;  %v1206_v59 = vshrl.u32 %v253_v62, 16  ;;  %v1209_v19 = vshll.u32 %v253_v62, 16 }
 0x124   : > { %v1476_v9 = vadd.f32 %v1403_v31, %v839_v6  ;;  %v610_v38 = vadd.f32 %v609_v17, %v4345_v14  ;;  %v1215_v6 = vshll.u32 %v254_v60, 16  ;;  %v1219_v31 = vshrl.u32 %v254_v60, 16 }
 0x125   : > { %v1620_v54 = vpop.f32.mrf.mxu0  ;;  %v1208_v53 = vrot.slane %v1206_v59, 4 }
 0x126   : > { %648 = vmatmul.bf16.gmra.mxu1 %v4104_v49  ;;  %808 = vmatmul.bf16.gmra.mxu2 %v4454_v21  ;;  %v4457_v34 = vadd.f32 %v1617_v51, %v1476_v9  ;;  %v1194_v49 = vsel %vm4144_vm2, %v1189_v32, %v1193_v58  ;;  %v1204_v51 = vsel %vm4144_vm2, %v1199_v39, %v1203_v16  ;;  %v1211_v9 = vrot.slane %v1209_v19, 5  ;;  %v255_v39 = vld [vmem:[%s3976_s29 + $0xb0] sm:$0x1]  ;;  %v3591_v19 = vld [vmem:[%s4963_s1 + $0x80] sm:$0xff] }
 0x127   : > { %1445 = vmatmul.bf16.gmra.mxu3 %v4418_v20  ;;  %v1296_v48 = vunpack.c.l.b16 %v1194_v49  ;;  %v1297_v50 = vunpack.c.l.b16 %v1204_v51  ;;  %v1217_v58 = vrot.slane %v1215_v6, 5  ;;  %v4475_v49 = vld [vmem:[%s3976_s29 + $0xa8] sm:$0xff]  ;;  %v256_v51 = vld [vmem:[%s3976_s29 + $0xb4] sm:$0xf]  ;;  %2198 = vmatpush.bf16.msra.mxu2 %v3591_v19 }
 0x128   : > { %4983 = vst [vmem:[#allocation18_spill] sm:$0xff] %v4457_v34  ;;  %1659 = vmatmul.bf16.gmra.mxu0 %v4449_v52  ;;  %v261_v34 = vld [vmem:[%s3976_s29 + $0xc8] sm:$0x1] }
 0x129   : > { %v769_v46 = vpop.f32.mrf.mxu2 }
 0x12a   : > { %v840_v14 = vadd.f32 %v769_v46, %v610_v38  ;;  %v1406_v47 = vpop.f32.mrf.mxu3  ;;  %v1221_v38 = vrot.slane %v1219_v31, 4 }
 0x12b   : > { %v611_v10 = vpop.f32.mrf.mxu1 }
 0x12c   : > { %v1477_v41 = vadd.f32 %v1406_v47, %v840_v14  ;;  %v612_v7 = vadd.f32 %v611_v10, %v4363_v13  ;;  %v4471_v13 = vpack.c.b16 %v1297_v50, %v1296_v48  ;;  %v1222_v47 = vor.u32 %v1221_v38, %v1217_v58 }
 0x12d   : > { %v1622_v12 = vpop.f32.mrf.mxu0  ;;  %v1225_v10 = vshll.u32 %v255_v39, 16  ;;  %v1230_v50 = vshrl.u32 %v256_v51, 16  ;;  %v1233_v38 = vshll.u32 %v256_v51, 16 }
 0x12e   : > { %v4468_v17 = vadd.f32 %v1620_v54, %v1477_v41  ;;  %4985 = vst [vmem:[#allocation20_spill] sm:$0xff] %v4471_v13  ;;  %v1212_v54 = vor.u32 %v1211_v9, %v1208_v53  ;;  %v257_v41 = vld [vmem:[%s3976_s29 + $0xb8] sm:$0xf]  ;;  %v1223_v31 = vrot.slane %v1222_v47, 4 }
 0x12f   : > { %v1227_v48 = vrot.slane %v1225_v10, 5  ;;  %v1243_v39 = vshrl.u32 %v257_v41, 16  ;;  %v1232_v47 = vrot.slane %v1230_v50, 4  ;;  %v1235_v10 = vrot.slane %v1233_v38, 5 }
 0x130   : > { %4984 = vst [vmem:[#allocation19_spill] sm:$0xff] %v4468_v17  ;;  %v1213_v6 = vrot.slane %v1212_v54, 4  ;;  %v3607_v54 = vld [vmem:[%s4963_s1 + $0x200] sm:$0xff]  ;;  %v3712_v17 = vld [vmem:[%s3976_s29 + $0x14] sm:$0x1] }
 0x131   : > { %v771_v32 = vpop.f32.mrf.mxu2  ;;  %v1245_v19 = vrot.slane %v1243_v39, 4  ;;  %2594 = vmatpush.bf16.msra.mxu0 %v3607_v54 }
 0x132   : > { %v841_v16 = vadd.f32 %v771_v32, %v612_v7  ;;  %v1408_v62 = vpop.f32.mrf.mxu3  ;;  %v1239_v32 = vshll.u32 %v257_v41, 16 }
 0x133   : > { %v614_v46 = vpop.f32.mrf.mxu1 }
 0x134   : > { %v1478_v14 = vadd.f32 %v1408_v62, %v841_v16  ;;  %v615_v7 = vadd.f32 %v614_v46, %v4230_v55  ;;  %v1228_v55 = vsel %vm4144_vm2, %v1223_v31, %v1227_v48  ;;  %v3583_v46 = vld [vmem:[%s4963_s1 + $0x1c0] sm:$0xff]  ;;  %v1241_v51 = vrot.slane %v1239_v32, 5 }
 0x135   : > { %v1625_v60 = vpop.f32.mrf.mxu0  ;;  %1817 = vmatpush.bf16.msra.mxu1 %v3583_v46 }
 0x136   : > { %653 = vmatmul.bf16.gmra.mxu1 %v4135_v18  ;;  %813 = vmatmul.bf16.gmra.mxu2 %v4475_v49  ;;  %v4479_v59 = vadd.f32 %v1622_v12, %v1478_v14  ;;  %v3599_v18 = vld [vmem:[%s4963_s1 + $0x140] sm:$0xff] }
 0x137   : > { %1450 = vmatmul.bf16.gmra.mxu3 %v4449_v52  ;;  %v3713_v52 = vld [vmem:[%s3976_s29 + $0x18] sm:$0xf] }
 0x138   : > { %4986 = vst [vmem:[#allocation21_spill] sm:$0xff] %v4479_v59  ;;  %1664 = vmatmul.bf16.gmra.mxu0 %v4471_v13  ;;  %2396 = vmatpush.bf16.msra.mxu3 %v3599_v18  ;;  %v1218_v59 = vsel %vm4144_vm2, %v1213_v6, %v1217_v58  ;;  %v1299_v18 = vunpack.c.l.b16 %v1228_v55  ;;  %v259_v55 = vld [vmem:[%s3976_s29 + $0xc0] sm:$0xf] }
 0x139   : > { %v774_v12 = vpop.f32.mrf.mxu2  ;;  %v1298_v58 = vunpack.c.l.b16 %v1218_v59  ;;  %v4509_v59 = vld [vmem:[%s3976_s29 + $0xb4] sm:$0xff] }
 0x13a   : > { %v842_v53 = vadd.f32 %v774_v12, %v615_v7  ;;  %v1411_v9 = vpop.f32.mrf.mxu3  ;;  %v258_v7 = vld [vmem:[%s3976_s29 + $0xbc] sm:$0x1] }
 0x13b   : > { %v616_v16 = vpop.f32.mrf.mxu1  ;;  %v1249_v50 = vshll.u32 %v258_v7, 16  ;;  %v4505_v32 = vpack.c.b16 %v1299_v18, %v1298_v58  ;;  %v3706_v58 = vld [vmem:[%s3976_s29 + $0x4] sm:$0xf] }
 0x13c   : > { %v1479_v62 = vadd.f32 %v1411_v9, %v842_v53  ;;  %v617_v6 = vadd.f32 %v616_v16, %v4259_v5  ;;  %v1236_v53 = vor.u32 %v1235_v10, %v1232_v47  ;;  %v1246_v9 = vor.u32 %v1245_v19, %v1241_v51  ;;  %v260_v47 = vld [vmem:[%s3976_s29 + $0xc4] sm:$0xf] }
 0x13d   : > { %v1627_v14 = vpop.f32.mrf.mxu0  ;;  %v1504_v10 = vshrl.u32 %v259_v55, 16  ;;  %v1507_v19 = vshll.u32 %v259_v55, 16  ;;  %v1952_v18 = vrot.slane %v3706_v58, 5  ;;  %v3710_v55 = vld [vmem:[%s3976_s29 + $0x1c] sm:$0xf] }
 0x13e   : > { %v4501_v41 = vadd.f32 %v1625_v60, %v1479_v62  ;;  %v1237_v5 = vrot.slane %v1236_v53, 4  ;;  %v1247_v16 = vrot.slane %v1246_v9, 4  ;;  %v1251_v62 = vrot.slane %v1249_v50, 5  ;;  %v3708_v53 = vld [vmem:[%s3976_s29 + $0x10] sm:$0xf] }
 0x13f   : > { %v1513_v50 = vshll.u32 %v260_v47, 16 }
 0x140   : > { %4987 = vst [vmem:[#allocation22_spill] sm:$0xff] %v4501_v41  ;;  %v3711_v41 = vld [vmem:[%s3976_s29 + $0xc] sm:$0xf] }
 0x141   : > { %v776_v31 = vpop.f32.mrf.mxu2 }
 0x142   : > { %v843_v48 = vadd.f32 %v776_v31, %v617_v6  ;;  %v1413_v12 = vpop.f32.mrf.mxu3  ;;  %v1252_v31 = vsel %vm4144_vm2, %v1247_v16, %v1251_v62  ;;  %v1506_v62 = vrot.slane %v1504_v10, 4 }
 0x143   : > { %v619_v38 = vpop.f32.mrf.mxu1  ;;  %v1301_v16 = vunpack.c.l.b16 %v1252_v31 }
 0x144   : > { %v1480_v39 = vadd.f32 %v1413_v12, %v843_v48  ;;  %v620_v54 = vadd.f32 %v619_v38, %v4271_v28  ;;  %v3707_v48 = vld [vmem:[%s3976_s29] sm:$0xf]  ;;  %v1959_v28 = vrot.slane %v3708_v53, 5  ;;  %v3709_v38 = vld [vmem:[%s3976_s29 + $0x8] sm:$0x1]  ;;  %v3357_v53 = vrot.slane %v3711_v41, 9 }
 0x145   : > { %v1630_v60 = vpop.f32.mrf.mxu0  ;;  %v3356_v12 = vrot.slane %v3707_v48, 9  ;;  %v1509_v48 = vrot.slane %v1507_v19, 5 }
 0x146   : > { %658 = vmatmul.bf16.gmra.mxu1 %v4454_v21  ;;  %818 = vmatmul.bf16.gmra.mxu2 %v4509_v59  ;;  %v4513_v46 = vadd.f32 %v1627_v14, %v1480_v39  ;;  %v1242_v14 = vsel %vm4144_vm2, %v1237_v5, %v1241_v51  ;;  %v1955_v39 = vrot.slane %v3709_v38, 5  ;;  %v1517_v51 = vshrl.u32 %v260_v47, 16 }
 0x147   : > { %1455 = vmatmul.bf16.gmra.mxu3 %v4471_v13  ;;  %v1300_v5 = vunpack.c.l.b16 %v1242_v14  ;;  %v1962_v13 = vrot.slane %v3712_v17, 5  ;;  %v1961_v38 = vrot.slane %v1959_v28, 4  ;;  %v1510_v41 = vor.u32 %v1509_v48, %v1506_v62 }
 0x148   : > { %4988 = vst [vmem:[#allocation23_spill] sm:$0xff] %v4513_v46  ;;  %1669 = vmatmul.bf16.gmra.mxu0 %v4505_v32  ;;  %v1954_v46 = vrot.slane %v1952_v18, 4  ;;  %v1519_v14 = vrot.slane %v1517_v51, 4  ;;  %v1523_v17 = vshll.u32 %v261_v34, 16 }
 0x149   : > { %v779_v21 = vpop.f32.mrf.mxu2  ;;  %v4536_v31 = vpack.c.b16 %v1301_v16, %v1300_v5  ;;  %v1963_v34 = vsel %vm4538_vm5, %v1961_v38, %v1962_v13 }
 0x14a   : > { %v844_v7 = vadd.f32 %v779_v21, %v620_v54  ;;  %v1416_v6 = vpop.f32.mrf.mxu3  ;;  %v1966_v54 = vrot.slane %v3710_v55, 5  ;;  %v3358_v55 = vrot.slane %v3713_v52, 9 }
 0x14b   : > { %v621_v9 = vpop.f32.mrf.mxu1 }
 0x14c   : > { %v1481_v21 = vadd.f32 %v1416_v6, %v844_v7  ;;  %v1969_v7 = vrot.slane %v3714_v11, 5  ;;  %v1515_v6 = vrot.slane %v1513_v50, 5  ;;  %v622_v47 = vadd.f32 %v621_v9, %v4287_v45 }
 0x14d   : > { %v1632_v58 = vpop.f32.mrf.mxu0  ;;  %v1968_v10 = vrot.slane %v1966_v54, 4  ;;  %v1953_v11 = vsel %vm4538_vm5, %v3356_v12, %v1952_v18  ;;  %v1956_v45 = vsel %vm4538_vm5, %v1954_v46, %v1955_v39  ;;  %v1960_v9 = vsel %vm4538_vm5, %v3357_v53, %v1959_v28  ;;  %v3715_v28 = vld [vmem:[%s3976_s29 + $0xc0] sm:$0xff] }
 0x14e   : > { %v4531_v43 = vadd.f32 %v1630_v60, %v1481_v21  ;;  %v2079_v51 = vunpack.c.l.b16 %v1953_v11  ;;  %v2080_v5 = vunpack.c.l.b16 %v1956_v45  ;;  %v2081_v16 = vunpack.c.l.b16 %v1960_v9 }
 0x14f   : > { %v1967_v18 = vsel %vm4538_vm5, %v3358_v55, %v1966_v54  ;;  %v1970_v46 = vsel %vm4538_vm5, %v1968_v10, %v1969_v7 }
 0x150   : > { %v2111_v12 = vpack.c.b16 %v2080_v5, %v2079_v51  ;;  %v2083_v39 = vunpack.c.l.b16 %v1967_v18  ;;  %v2084_v13 = vunpack.c.l.b16 %v1970_v46 }
 0x151   : > { %v781_v19 = vpop.f32.mrf.mxu2 }
 0x152   : > { %v845_v21 = vadd.f32 %v781_v19, %v622_v47  ;;  %v1418_v52 = vpop.f32.mrf.mxu3  ;;  %v1520_v47 = vor.u32 %v1519_v14, %v1515_v6  ;;  %v2082_v19 = vunpack.c.l.b16 %v1963_v34  ;;  %v1511_v14 = vrot.slane %v1510_v41, 4 }
 0x153   : > { %v624_v50 = vpop.f32.mrf.mxu1  ;;  %v4563_v7 = vpack.c.b16 %v2084_v13, %v2083_v39 }
 0x154   : > { %v1482_v62 = vadd.f32 %v1418_v52, %v845_v21  ;;  %v4556_v53 = vpack.c.b16 %v2082_v19, %v2081_v16  ;;  %v625_v54 = vadd.f32 %v624_v50, %v4300_v3  ;;  %v1521_v55 = vrot.slane %v1520_v47, 4 }
 0x155   : > { %v1635_v48 = vpop.f32.mrf.mxu0  ;;  %v1525_v21 = vrot.slane %v1523_v17, 5 }
 0x156   : > { %663 = vmatmul.bf16.gmra.mxu1 %v4475_v49  ;;  %823 = vmatmul.bf16.gmra.mxu2 %v3715_v28  ;;  %v4558_v38 = vadd.f32 %v1632_v58, %v1482_v62  ;;  %v1516_v58 = vsel %vm4144_vm2, %v1511_v14, %v1515_v6  ;;  %v3542_v62 = vld [vmem:[%s3976_s29 + $0xcc] sm:$0xff] }
 0x157   : > { %1460 = vmatmul.bf16.gmra.mxu3 %v4505_v32  ;;  %v1526_v51 = vsel %vm4144_vm2, %v1521_v55, %v1525_v21  ;;  %v1544_v3 = vunpack.c.l.b16 %v1516_v58 }
 0x158   : > { %1674 = vmatmul.bf16.gmra.mxu0 %v4536_v31  ;;  %v1545_v50 = vunpack.c.l.b16 %v1526_v51  ;;  %v3717_v51 = vld [vmem:[%s3976_s29 + $0x24] sm:$0xf] }
 0x159   : > { %v784_v49 = vpop.f32.mrf.mxu2 }
 0x15a   : > { %v846_v10 = vadd.f32 %v784_v49, %v625_v54  ;;  %v1421_v52 = vpop.f32.mrf.mxu3  ;;  %v4573_v19 = vpack.c.b16 %v1545_v50, %v1544_v3  ;;  %v3359_v3 = vrot.slane %v3717_v51, 9 }
 0x15b   : > { %v626_v11 = vpop.f32.mrf.mxu1 }
 0x15c   : > { %v1483_v45 = vadd.f32 %v1421_v52, %v846_v10  ;;  %v627_v17 = vadd.f32 %v626_v11, %v4322_v40 }
 0x15d   : > { %v1637_v9 = vpop.f32.mrf.mxu0 }
 0x15e   : > { %v4569_v41 = vadd.f32 %v1635_v48, %v1483_v45 }
 0x161   : > { %v786_v5 = vpop.f32.mrf.mxu2 }
 0x162   : > { %v847_v34 = vadd.f32 %v786_v5, %v627_v17  ;;  %v1423_v16 = vpop.f32.mrf.mxu3  ;;  %v3718_v17 = vld [vmem:[%s3976_s29 + $0x2c] sm:$0x1] }
 0x163   : > { %v629_v47 = vpop.f32.mrf.mxu1  ;;  %v1976_v5 = vrot.slane %v3718_v17, 5 }
 0x164   : > { %v1484_v18 = vadd.f32 %v1423_v16, %v847_v34  ;;  %v630_v40 = vadd.f32 %v629_v47, %v4341_v8 }
 0x165   : > { %v1640_v46 = vpop.f32.mrf.mxu0 }
 0x166   : > { %668 = vmatmul.bf16.gmra.mxu1 %v4509_v59  ;;  %828 = vmatmul.bf16.gmra.mxu2 %v3542_v62  ;;  %v4576_v6 = vadd.f32 %v1637_v9, %v1484_v18  ;;  %v3716_v9 = vld [vmem:[%s3976_s29 + $0x28] sm:$0xf] }
 0x167   : > { %1465 = vmatmul.bf16.gmra.mxu3 %v4536_v31  ;;  %v1973_v8 = vrot.slane %v3716_v9, 5 }
 0x168   : > { %1679 = vmatmul.bf16.gmra.mxu0 %v4573_v19 }
 0x169   : > { %v789_v48 = vpop.f32.mrf.mxu2  ;;  %v1975_v50 = vrot.slane %v1973_v8, 4  ;;  %v1974_v18 = vsel %vm4538_vm5, %v3359_v3, %v1973_v8 }
 0x16a   : > { %v848_v39 = vadd.f32 %v789_v48, %v630_v40  ;;  %v1426_v28 = vpop.f32.mrf.mxu3 }
 0x16b   : > { %v631_v13 = vpop.f32.mrf.mxu1 }
 0x16c   : > { %v1485_v14 = vadd.f32 %v1426_v28, %v848_v39  ;;  %v632_v59 = vadd.f32 %v631_v13, %v4361_v37 }
 0x16d   : > { %v1642_v54 = vpop.f32.mrf.mxu0 }
 0x16e   : > { %v4581_v55 = vadd.f32 %v1640_v46, %v1485_v14  ;;  %v1977_v46 = vsel %vm4538_vm5, %v1975_v50, %v1976_v5 }
 0x16f   : > { %v2086_v48 = vunpack.c.l.b16 %v1977_v46 }
 0x171   : > { %v791_v21 = vpop.f32.mrf.mxu2 }
 0x172   : > { %v849_v49 = vadd.f32 %v791_v21, %v632_v59  ;;  %v1428_v10 = vpop.f32.mrf.mxu3 }
 0x173   : > { %v634_v52 = vpop.f32.mrf.mxu1 }
 0x174   : > { %v1486_v11 = vadd.f32 %v1428_v10, %v849_v49  ;;  %v635_v37 = vadd.f32 %v634_v52, %v4248_v22  ;;  %v2085_v22 = vunpack.c.l.b16 %v1974_v18  ;;  %v3719_v10 = vld [vmem:[%s3976_s29 + $0x34] sm:$0xf] }
 0x175   : > { %v1645_v45 = vpop.f32.mrf.mxu0  ;;  %v1980_v52 = vrot.slane %v3719_v10, 5 }
 0x176   : > { %1818 = vmatmul.bf16.vlgmr.msra.gmra.mxu1 %v4180_v35  ;;  %2199 = vmatmul.bf16.vlgmr.msra.gmra.mxu2 %v2111_v12  ;;  %v4586_v58 = vadd.f32 %v1642_v54, %v1486_v11  ;;  %v4600_v59 = vpack.c.b16 %v2086_v48, %v2085_v22 }
 0x177   : > { %2397 = vmatmul.bf16.vlgmr.msra.gmra.mxu3 %v4556_v53  ;;  %v1982_v8 = vrot.slane %v1980_v52, 4 }
 0x178   : > { %2595 = vmatmul.bf16.vlgmr.msra.gmra.mxu0 %v4563_v7 }
 0x179   : > { %v794_v34 = vpop.f32.mrf.mxu2 }
 0x17a   : > { %v850_v16 = vadd.f32 %v794_v34, %v635_v37  ;;  %v1431_v62 = vpop.f32.mrf.mxu3  ;;  %v3721_v37 = vld [vmem:[%s3976_s29 + $0x38] sm:$0x1] }
 0x17b   : > { %v636_v47 = vpop.f32.mrf.mxu1  ;;  %v1983_v51 = vrot.slane %v3721_v37, 5 }
 0x17c   : > { %v1487_v35 = vadd.f32 %v1431_v62, %v850_v16  ;;  %v637_v39 = vadd.f32 %v636_v47, %v4267_v26 }
 0x17d   : > { %v1647_v12 = vpop.f32.mrf.mxu0  ;;  %v1984_v16 = vsel %vm4538_vm5, %v1982_v8, %v1983_v51 }
 0x17e   : > { %v4597_v40 = vadd.f32 %v1645_v45, %v1487_v35  ;;  %v3720_v45 = vld [vmem:[%s3976_s29 + $0x30] sm:$0xf]  ;;  %v2088_v47 = vunpack.c.l.b16 %v1984_v16 }
 0x17f   : > { %v3360_v9 = vrot.slane %v3720_v45, 9 }
 0x181   : > { %v796_v28 = vpop.f32.mrf.mxu2  ;;  %v1981_v34 = vsel %vm4538_vm5, %v3360_v9, %v1980_v52  ;;  %v3724_v52 = vld [vmem:[%s3976_s29 + $0x44] sm:$0x1] }
 0x182   : > { %v851_v13 = vadd.f32 %v796_v28, %v637_v39  ;;  %v1433_v14 = vpop.f32.mrf.mxu3 }
 0x183   : > { %v639_v54 = vpop.f32.mrf.mxu1 }
 0x184   : > { %v1488_v21 = vadd.f32 %v1433_v14, %v851_v13  ;;  %v640_v26 = vadd.f32 %v639_v54, %v4281_v42  ;;  %v2087_v42 = vunpack.c.l.b16 %v1981_v34  ;;  %v3722_v13 = vld [vmem:[%s3976_s29 + $0x40] sm:$0xf] }
 0x185   : > { %v1650_v49 = vpop.f32.mrf.mxu0  ;;  %v1987_v14 = vrot.slane %v3722_v13, 5  ;;  %v3727_v13 = vld [vmem:[%s3976_s29 + $0x50] sm:$0x1] }
 0x186   : > { %1823 = vmatmul.bf16.gmra.mxu1 %v4192_v57  ;;  %2204 = vmatmul.bf16.gmra.mxu2 %v4556_v53  ;;  %v4605_v11 = vadd.f32 %v1647_v12, %v1488_v21  ;;  %v4619_v48 = vpack.c.b16 %v2088_v47, %v2087_v42  ;;  %v3723_v21 = vld [vmem:[%s3976_s29 + $0x3c] sm:$0xf] }
 0x187   : > { %2402 = vmatmul.bf16.gmra.mxu3 %v4563_v7  ;;  %v1989_v10 = vrot.slane %v1987_v14, 4 }
 0x188   : > { %2600 = vmatmul.bf16.gmra.mxu0 %v4600_v59 }
 0x189   : > { %v799_v3 = vpop.f32.mrf.mxu2 }
 0x18a   : > { %v852_v50 = vadd.f32 %v799_v3, %v640_v26  ;;  %v1436_v17 = vpop.f32.mrf.mxu3  ;;  %v1990_v26 = vrot.slane %v3724_v52, 5 }
 0x18b   : > { %v641_v5 = vpop.f32.mrf.mxu1 }
 0x18c   : > { %v1489_v57 = vadd.f32 %v1436_v17, %v852_v50  ;;  %v642_v35 = vadd.f32 %v641_v5, %v4295_v0  ;;  %v1991_v3 = vsel %vm4538_vm5, %v1989_v10, %v1990_v26 }
 0x18d   : > { %v1652_v53 = vpop.f32.mrf.mxu0  ;;  %v2090_v17 = vunpack.c.l.b16 %v1991_v3 }
 0x18e   : > { %v4616_v62 = vadd.f32 %v1650_v49, %v1489_v57  ;;  %v3361_v49 = vrot.slane %v3723_v21, 9 }
 0x190   : > { %v1988_v51 = vsel %vm4538_vm5, %v3361_v49, %v1987_v14  ;;  %v1997_v14 = vrot.slane %v3727_v13, 5 }
 0x191   : > { %v801_v12 = vpop.f32.mrf.mxu2 }
 0x192   : > { %v853_v18 = vadd.f32 %v801_v12, %v642_v35  ;;  %v1438_v46 = vpop.f32.mrf.mxu3  ;;  %v3725_v12 = vld [vmem:[%s3976_s29 + $0x4c] sm:$0xf] }
 0x193   : > { %v644_v22 = vpop.f32.mrf.mxu1 }
 0x194   : > { %v1490_v39 = vadd.f32 %v1438_v46, %v853_v18  ;;  %v645_v0 = vadd.f32 %v644_v22, %v4318_v30  ;;  %v2089_v30 = vunpack.c.l.b16 %v1988_v51  ;;  %v1994_v18 = vrot.slane %v3725_v12, 5  ;;  %v3726_v22 = vld [vmem:[%s3976_s29 + $0x48] sm:$0xf] }
 0x195   : > { %v1655_v28 = vpop.f32.mrf.mxu0 }
 0x196   : > { %1828 = vmatmul.bf16.gmra.mxu1 %v4217_v24  ;;  %2209 = vmatmul.bf16.gmra.mxu2 %v4563_v7  ;;  %v4624_v54 = vadd.f32 %v1652_v53, %v1490_v39  ;;  %v4638_v42 = vpack.c.b16 %v2090_v17, %v2089_v30  ;;  %v3362_v39 = vrot.slane %v3726_v22, 9 }
 0x197   : > { %2407 = vmatmul.bf16.gmra.mxu3 %v4600_v59 }
 0x198   : > { %2605 = vmatmul.bf16.gmra.mxu0 %v4619_v48  ;;  %v1995_v52 = vsel %vm4538_vm5, %v3362_v39, %v1994_v18 }
 0x199   : > { %v804_v45 = vpop.f32.mrf.mxu2 }
 0x19a   : > { %v854_v9 = vadd.f32 %v804_v45, %v645_v0  ;;  %v1441_v8 = vpop.f32.mrf.mxu3 }
 0x19b   : > { %v646_v37 = vpop.f32.mrf.mxu1 }
 0x19c   : > { %v1491_v24 = vadd.f32 %v1441_v8, %v854_v9  ;;  %v647_v5 = vadd.f32 %v646_v37, %v4337_v61 }
 0x19d   : > { %v1657_v7 = vpop.f32.mrf.mxu0 }
 0x19e   : > { %v4635_v50 = vadd.f32 %v1655_v28, %v1491_v24  ;;  %v1996_v28 = vrot.slane %v1994_v18, 4 }
 0x1a0   : > { %v1998_v26 = vsel %vm4538_vm5, %v1996_v28, %v1997_v14 }
 0x1a1   : > { %v806_v57 = vpop.f32.mrf.mxu2  ;;  %v2092_v9 = vunpack.c.l.b16 %v1998_v26 }
 0x1a2   : > { %v855_v53 = vadd.f32 %v806_v57, %v647_v5  ;;  %v1443_v34 = vpop.f32.mrf.mxu3  ;;  %v3728_v5 = vld [vmem:[%s3976_s29 + $0x58] sm:$0xf] }
 0x1a3   : > { %v649_v16 = vpop.f32.mrf.mxu1  ;;  %v2001_v57 = vrot.slane %v3728_v5, 5 }
 0x1a4   : > { %v1492_v47 = vadd.f32 %v1443_v34, %v855_v53  ;;  %v650_v61 = vadd.f32 %v649_v16, %v4353_v23  ;;  %v2091_v23 = vunpack.c.l.b16 %v1995_v52  ;;  %v3729_v34 = vld [vmem:[%s3976_s29 + $0x54] sm:$0xf] }
 0x1a5   : > { %v1660_v35 = vpop.f32.mrf.mxu0  ;;  %v3363_v16 = vrot.slane %v3729_v34, 9 }
 0x1a6   : > { %1833 = vmatmul.bf16.gmra.mxu1 %v4232_v56  ;;  %2214 = vmatmul.bf16.gmra.mxu2 %v4600_v59  ;;  %v4643_v46 = vadd.f32 %v1657_v7, %v1492_v47  ;;  %v4657_v3 = vpack.c.b16 %v2092_v9, %v2091_v23  ;;  %v2003_v47 = vrot.slane %v2001_v57, 4  ;;  %v3731_v9 = vld [vmem:[%s3976_s29 + $0x64] sm:$0xf] }
 0x1a7   : > { %2412 = vmatmul.bf16.gmra.mxu3 %v4619_v48  ;;  %v2002_v28 = vsel %vm4538_vm5, %v3363_v16, %v2001_v57 }
 0x1a8   : > { %2610 = vmatmul.bf16.gmra.mxu0 %v4638_v42 }
 0x1a9   : > { %v809_v0 = vpop.f32.mrf.mxu2 }
 0x1aa   : > { %v856_v21 = vadd.f32 %v809_v0, %v650_v61  ;;  %v1446_v49 = vpop.f32.mrf.mxu3 }
 0x1ab   : > { %v651_v10 = vpop.f32.mrf.mxu1 }
 0x1ac   : > { %v1493_v56 = vadd.f32 %v1446_v49, %v856_v21  ;;  %v652_v8 = vadd.f32 %v651_v10, %v4366_v1 }
 0x1ad   : > { %v1662_v59 = vpop.f32.mrf.mxu0 }
 0x1ae   : > { %v4654_v45 = vadd.f32 %v1660_v35, %v1493_v56  ;;  %v3730_v35 = vld [vmem:[%s3976_s29 + $0x5c] sm:$0x1] }
 0x1af   : > { %v2004_v12 = vrot.slane %v3730_v35, 5 }
 0x1b1   : > { %v811_v37 = vpop.f32.mrf.mxu2  ;;  %v2005_v13 = vsel %vm4538_vm5, %v2003_v47, %v2004_v12 }
 0x1b2   : > { %v857_v24 = vadd.f32 %v811_v37, %v652_v8  ;;  %v1448_v7 = vpop.f32.mrf.mxu3  ;;  %v2094_v0 = vunpack.c.l.b16 %v2005_v13  ;;  %v2008_v8 = vrot.slane %v3731_v9, 5 }
 0x1b3   : > { %v654_v51 = vpop.f32.mrf.mxu1 }
 0x1b4   : > { %v1494_v30 = vadd.f32 %v1448_v7, %v857_v24  ;;  %v655_v1 = vadd.f32 %v654_v51, %v4250_v2  ;;  %v2093_v2 = vunpack.c.l.b16 %v2002_v28  ;;  %v3732_v24 = vld [vmem:[%s3976_s29 + $0x60] sm:$0xf]  ;;  %v2010_v51 = vrot.slane %v2008_v8, 4 }
 0x1b5   : > { %v1665_v17 = vpop.f32.mrf.mxu0  ;;  %v3364_v7 = vrot.slane %v3732_v24, 9 }
 0x1b6   : > { %1838 = vmatmul.bf16.gmra.mxu1 %v4273_v29  ;;  %2219 = vmatmul.bf16.gmra.mxu2 %v4619_v48  ;;  %v4662_v53 = vadd.f32 %v1662_v59, %v1494_v30  ;;  %v4676_v52 = vpack.c.b16 %v2094_v0, %v2093_v2  ;;  %v3733_v30 = vld [vmem:[%s3976_s29 + $0x68] sm:$0x1]  ;;  %v3734_v2 = vld [vmem:[%s3976_s29 + $0x70] sm:$0xf] }
 0x1b7   : > { %2417 = vmatmul.bf16.gmra.mxu3 %v4638_v42  ;;  %v2009_v16 = vsel %vm4538_vm5, %v3364_v7, %v2008_v8  ;;  %v2015_v0 = vrot.slane %v3734_v2, 5  ;;  %v3738_v2 = vld [vmem:[%s3976_s29 + $0x78] sm:$0xf] }
 0x1b8   : > { %2615 = vmatmul.bf16.gmra.mxu0 %v4657_v3 }
 0x1b9   : > { %v814_v18 = vpop.f32.mrf.mxu2 }
 0x1ba   : > { %v858_v61 = vadd.f32 %v814_v18, %v655_v1  ;;  %v1451_v22 = vpop.f32.mrf.mxu3 }
 0x1bb   : > { %v656_v39 = vpop.f32.mrf.mxu1 }
 0x1bc   : > { %v1495_v29 = vadd.f32 %v1451_v22, %v858_v61  ;;  %v657_v21 = vadd.f32 %v656_v39, %v4269_v27 }
 0x1bd   : > { %v1667_v48 = vpop.f32.mrf.mxu0 }
 0x1be   : > { %v4673_v14 = vadd.f32 %v1665_v17, %v1495_v29  ;;  %v2011_v17 = vrot.slane %v3733_v30, 5 }
 0x1c0   : > { %v2012_v47 = vsel %vm4538_vm5, %v2010_v51, %v2011_v17 }
 0x1c1   : > { %v816_v49 = vpop.f32.mrf.mxu2  ;;  %v2096_v12 = vunpack.c.l.b16 %v2012_v47 }
 0x1c2   : > { %v859_v10 = vadd.f32 %v816_v49, %v657_v21  ;;  %v1453_v56 = vpop.f32.mrf.mxu3  ;;  %v4991_v21 = vld [vmem:[#allocation10_spill] sm:$0xff] }
 0x1c3   : > { %v659_v59 = vpop.f32.mrf.mxu1 }
 0x1c4   : > { %v1496_v26 = vadd.f32 %v1453_v56, %v859_v10  ;;  %v660_v27 = vadd.f32 %v659_v59, %v4285_v44  ;;  %v2095_v44 = vunpack.c.l.b16 %v2009_v16  ;;  %v3735_v56 = vld [vmem:[%s3976_s29 + $0x6c] sm:$0xf] }
 0x1c5   : > { %v1670_v23 = vpop.f32.mrf.mxu0  ;;  %v3365_v59 = vrot.slane %v3735_v56, 9 }
 0x1c6   : > { %1843 = vmatmul.bf16.gmra.mxu1 %v4302_v4  ;;  %2224 = vmatmul.bf16.gmra.mxu2 %v4638_v42  ;;  %v4681_v37 = vadd.f32 %v1667_v48, %v1496_v26  ;;  %v4695_v48 = vpack.c.b16 %v2096_v12, %v2095_v44  ;;  %v2017_v26 = vrot.slane %v2015_v0, 4 }
 0x1c7   : > { %2422 = vmatmul.bf16.gmra.mxu3 %v4657_v3  ;;  %v2016_v30 = vsel %vm4538_vm5, %v3365_v59, %v2015_v0  ;;  %v3366_v0 = vrot.slane %v3738_v2, 9 }
 0x1c8   : > { %2620 = vmatmul.bf16.gmra.mxu0 %v4676_v52 }
 0x1c9   : > { %v819_v5 = vpop.f32.mrf.mxu2 }
 0x1ca   : > { %v860_v57 = vadd.f32 %v819_v5, %v660_v27  ;;  %v1456_v1 = vpop.f32.mrf.mxu3 }
 0x1cb   : > { %v661_v34 = vpop.f32.mrf.mxu1 }
 0x1cc   : > { %v1497_v4 = vadd.f32 %v1456_v1, %v860_v57  ;;  %v662_v18 = vadd.f32 %v661_v34, %v4298_v33  ;;  %v4992_v33 = vld [vmem:[#allocation8_spill] sm:$0xff]  ;;  %v2097_v57 = vunpack.c.l.b16 %v2016_v30  ;;  %v4993_v34 = vld [vmem:[#allocation9_spill] sm:$0xff] }
 0x1cd   : > { %v1672_v42 = vpop.f32.mrf.mxu0 }
 0x1ce   : > { %v4692_v35 = vadd.f32 %v1670_v23, %v1497_v4  ;;  %v3736_v23 = vld [vmem:[%s3976_s29 + $0x74] sm:$0x1] }
 0x1cf   : > { %v2018_v9 = vrot.slane %v3736_v23, 5 }
 0x1d1   : > { %v821_v61 = vpop.f32.mrf.mxu2  ;;  %v2019_v17 = vsel %vm4538_vm5, %v2017_v26, %v2018_v9 }
 0x1d2   : > { %v861_v22 = vadd.f32 %v821_v61, %v662_v18  ;;  %v1458_v39 = vpop.f32.mrf.mxu3  ;;  %v2098_v1 = vunpack.c.l.b16 %v2019_v17 }
 0x1d3   : > { %v664_v29 = vpop.f32.mrf.mxu1 }
 0x1d4   : > { %v1498_v28 = vadd.f32 %v1458_v39, %v861_v22  ;;  %v665_v10 = vadd.f32 %v664_v29, %v4992_v33  ;;  %v4714_v12 = vpack.c.b16 %v2098_v1, %v2097_v57  ;;  %v3737_v22 = vld [vmem:[%s3976_s29 + $0x7c] sm:$0xf]  ;;  %v3739_v33 = vld [vmem:[%s3976_s29 + $0x80] sm:$0x1] }
 0x1d5   : > { %v1675_v13 = vpop.f32.mrf.mxu0  ;;  %v2022_v39 = vrot.slane %v3737_v22, 5  ;;  %v3741_v22 = vld [vmem:[%s3976_s29 + $0x84] sm:$0xf] }
 0x1d6   : > { %1848 = vmatmul.bf16.gmra.mxu1 %v4991_v21  ;;  %2229 = vmatmul.bf16.gmra.mxu2 %v4657_v3  ;;  %v4700_v49 = vadd.f32 %v1672_v42, %v1498_v28  ;;  %v4994_v28 = vld [vmem:[#allocation11_spill] sm:$0xff] }
 0x1d7   : > { %2427 = vmatmul.bf16.gmra.mxu3 %v4676_v52  ;;  %v2024_v21 = vrot.slane %v2022_v39, 4  ;;  %v2023_v9 = vsel %vm4538_vm5, %v3366_v0, %v2022_v39  ;;  %v3367_v39 = vrot.slane %v3741_v22, 9 }
 0x1d8   : > { %2625 = vmatmul.bf16.gmra.mxu0 %v4695_v48 }
 0x1d9   : > { %v824_v8 = vpop.f32.mrf.mxu2 }
 0x1da   : > { %v862_v27 = vadd.f32 %v824_v8, %v665_v10  ;;  %v1461_v24 = vpop.f32.mrf.mxu3  ;;  %v2025_v10 = vrot.slane %v3739_v33, 5 }
 0x1db   : > { %v666_v7 = vpop.f32.mrf.mxu1 }
 0x1dc   : > { %v1499_v51 = vadd.f32 %v1461_v24, %v862_v27  ;;  %v667_v4 = vadd.f32 %v666_v7, %v4993_v34  ;;  %v2026_v8 = vsel %vm4538_vm5, %v2024_v21, %v2025_v10  ;;  %v2099_v24 = vunpack.c.l.b16 %v2023_v9 }
 0x1dd   : > { %v1677_v3 = vpop.f32.mrf.mxu0  ;;  %v2100_v7 = vunpack.c.l.b16 %v2026_v8 }
 0x1de   : > { %v4711_v5 = vadd.f32 %v1675_v13, %v1499_v51  ;;  %v4995_v51 = vld [vmem:[#allocation12_spill] sm:$0xff] }
 0x1df   : > { %v4733_v34 = vpack.c.b16 %v2100_v7, %v2099_v24 }
 0x1e1   : > { %v826_v42 = vpop.f32.mrf.mxu2 }
 0x1e2   : > { %v863_v16 = vadd.f32 %v826_v42, %v667_v4  ;;  %v1463_v47 = vpop.f32.mrf.mxu3 }
 0x1e3   : > { %v669_v44 = vpop.f32.mrf.mxu1 }
 0x1e4   : > { %v1500_v18 = vadd.f32 %v1463_v47, %v863_v16  ;;  %v670_v13 = vadd.f32 %v669_v44, %v4994_v28  ;;  %v3740_v16 = vld [vmem:[%s3976_s29 + $0x88] sm:$0xf] }
 0x1e5   : > { %v1680_v61 = vpop.f32.mrf.mxu0  ;;  %v2029_v47 = vrot.slane %v3740_v16, 5 }
 0x1e6   : > { %1853 = vmatmul.bf16.gmra.mxu1 %v4370_v15  ;;  %2234 = vmatmul.bf16.gmra.mxu2 %v4676_v52  ;;  %v4719_v29 = vadd.f32 %v1677_v3, %v1500_v18  ;;  %v4996_v18 = vld [vmem:[#allocation13_spill] sm:$0xff] }
 0x1e7   : > { %2432 = vmatmul.bf16.gmra.mxu3 %v4695_v48  ;;  %v2031_v28 = vrot.slane %v2029_v47, 4 }
 0x1e8   : > { %2630 = vmatmul.bf16.gmra.mxu0 %v4714_v12 }
 0x1e9   : > { %v829_v56 = vpop.f32.mrf.mxu2 }
 0x1ea   : > { %v864_v59 = vadd.f32 %v829_v56, %v670_v13  ;;  %v1466_v26 = vpop.f32.mrf.mxu3  ;;  %v3742_v13 = vld [vmem:[%s3976_s29 + $0x8c] sm:$0x1]  ;;  %v2030_v56 = vsel %vm4538_vm5, %v3367_v39, %v2029_v47 }
 0x1eb   : > { %v671_v23 = vpop.f32.mrf.mxu1  ;;  %v2032_v2 = vrot.slane %v3742_v13, 5 }
 0x1ec   : > { %v1501_v15 = vadd.f32 %v1466_v26, %v864_v59  ;;  %v672_v3 = vadd.f32 %v671_v23, %v4995_v51  ;;  %v2101_v23 = vunpack.c.l.b16 %v2030_v56 }
 0x1ed   : > { %v1682_v52 = vpop.f32.mrf.mxu0  ;;  %v2033_v59 = vsel %vm4538_vm5, %v2031_v28, %v2032_v2 }
 0x1ee   : > { %v4730_v27 = vadd.f32 %v1680_v61, %v1501_v15  ;;  %v2102_v15 = vunpack.c.l.b16 %v2033_v59 }
 0x1f1   : > { %v831_v30 = vpop.f32.mrf.mxu2 }
 0x1f2   : > { %v865_v17 = vadd.f32 %v831_v30, %v672_v3  ;;  %v1468_v57 = vpop.f32.mrf.mxu3  ;;  %v4757_v3 = vpack.c.b16 %v2102_v15, %v2101_v23  ;;  %v3743_v30 = vld [vmem:[%s3976_s29 + $0x94] sm:$0xf]  ;;  %v4998_v15 = vld [vmem:[#allocation15_spill] sm:$0xff] }
 0x1f3   : > { %v1819_v1 = vpop.f32.mrf.mxu1 }
 0x1f4   : > { %v1502_v4 = vadd.f32 %v1468_v57, %v865_v17  ;;  %v1899_v61 = vadd.f32 %v1819_v1, %v4996_v18  ;;  %v2036_v17 = vrot.slane %v3743_v30, 5  ;;  %v3745_v18 = vld [vmem:[%s3976_s29 + $0x98] sm:$0x1] }
 0x1f5   : > { %v2596_v42 = vpop.f32.mrf.mxu0 }
 0x1f6   : > { %1858 = vmatmul.bf16.gmra.mxu1 %v4399_v25  ;;  %2239 = vmatmul.bf16.gmra.mxu2 %v4695_v48  ;;  %v4738_v44 = vadd.f32 %v1682_v52, %v1502_v4  ;;  %v4997_v52 = vld [vmem:[#allocation14_spill] sm:$0xff]  ;;  %v2038_v47 = vrot.slane %v2036_v17, 4 }
 0x1f7   : > { %2437 = vmatmul.bf16.gmra.mxu3 %v4714_v12 }
 0x1f8   : > { %2635 = vmatmul.bf16.gmra.mxu0 %v4733_v34 }
 0x1f9   : > { %v2200_v0 = vpop.f32.mrf.mxu2 }
 0x1fa   : > { %v2280_v25 = vadd.f32 %v2200_v0, %v1899_v61  ;;  %v2398_v48 = vpop.f32.mrf.mxu3  ;;  %v2039_v61 = vrot.slane %v3745_v18, 5 }
 0x1fb   : > { %v1821_v21 = vpop.f32.mrf.mxu1 }
 0x1fc   : > { %v2478_v33 = vadd.f32 %v2398_v48, %v2280_v25  ;;  %v1900_v9 = vadd.f32 %v1821_v21, %v4997_v52 }
 0x1fd   : > { %v2598_v10 = vpop.f32.mrf.mxu0 }
 0x1fe   : > { %v2676_v26 = vadd.f32 %v2596_v42, %v2478_v33  ;;  %v3744_v42 = vld [vmem:[%s3976_s29 + $0x90] sm:$0xf] }
 0x1ff   : > { %v3368_v16 = vrot.slane %v3744_v42, 9 }
 0x200   : > { %2708 = vst [vmem:[%s4753_s5] sm:$0xff] %v2676_v26  ;;  %v2777_v22 = vmul.f32 %v2676_v26, %v2676_v26 }
 0x201   : > { %v2202_v8 = vpop.f32.mrf.mxu2  ;;  %v2037_v33 = vsel %vm4538_vm5, %v3368_v16, %v2036_v17  ;;  %v3746_v17 = vld [vmem:[%s3976_s29 + $0xa0] sm:$0xf]  ;;  %v4999_v16 = vld [vmem:[#allocation17_spill] sm:$0xff] }
 0x202   : > { %v2281_v24 = vadd.f32 %v2202_v8, %v1900_v9  ;;  %v2400_v7 = vpop.f32.mrf.mxu3  ;;  %v2103_v59 = vunpack.c.l.b16 %v2037_v33 }
 0x203   : > { %v1824_v51 = vpop.f32.mrf.mxu1 }
 0x204   : > { %v2479_v57 = vadd.f32 %v2400_v7, %v2281_v24  ;;  %v1901_v13 = vadd.f32 %v1824_v51, %v4415_v63 }
 0x205   : > { %v2601_v1 = vpop.f32.mrf.mxu0 }
 0x206   : > { %v2677_v4 = vadd.f32 %v2598_v10, %v2479_v57  ;;  %1863 = vmatmul.bf16.gmra.mxu1 %v4418_v20  ;;  %2244 = vmatmul.bf16.gmra.mxu2 %v4714_v12  ;;  %v2040_v10 = vsel %vm4538_vm5, %v2038_v47, %v2039_v61  ;;  %v2043_v57 = vrot.slane %v3746_v17, 5  ;;  %v3747_v47 = vld [vmem:[%s3976_s29 + $0x9c] sm:$0xf] }
 0x207   : > { %2442 = vmatmul.bf16.gmra.mxu3 %v4733_v34  ;;  %v3369_v18 = vrot.slane %v3747_v47, 9 }
 0x208   : > { %2640 = vmatmul.bf16.gmra.mxu0 %v4757_v3  ;;  %2709 = vst [vmem:[%s4753_s5 + $0x8] sm:$0xff] %v2677_v4  ;;  %v2740_v39 = vadd.f32 %v2677_v4, %v2676_v26  ;;  %v2778_v28 = vmul.f32 %v2677_v4, %v2677_v4  ;;  %v2104_v26 = vunpack.c.l.b16 %v2040_v10  ;;  %v2045_v61 = vrot.slane %v2043_v57, 4 }
 0x209   : > { %v2205_v2 = vpop.f32.mrf.mxu2  ;;  %v2044_v10 = vsel %vm4538_vm5, %v3369_v18, %v2043_v57  ;;  %v3749_v57 = vld [vmem:[%s3976_s29 + $0xac] sm:$0xf]  ;;  %v5002_v18 = vld [vmem:[#allocation20_spill] sm:$0xff] }
 0x20a   : > { %v2809_v20 = vadd.f32 %v2778_v28, %v2777_v22  ;;  %v2282_v0 = vadd.f32 %v2205_v2, %v1901_v13  ;;  %v2403_v12 = vpop.f32.mrf.mxu3  ;;  %v4774_v30 = vpack.c.b16 %v2104_v26, %v2103_v59  ;;  %v5000_v28 = vld [vmem:[#allocation16_spill] sm:$0xff]  ;;  %v2105_v26 = vunpack.c.l.b16 %v2044_v10 }
 0x20b   : > { %v1826_v25 = vpop.f32.mrf.mxu1  ;;  %v3748_v2 = vld [vmem:[%s3976_s29 + $0xa4] sm:$0x1] }
 0x20c   : > { %v2480_v48 = vadd.f32 %v2403_v12, %v2282_v0  ;;  %v1902_v52 = vadd.f32 %v1826_v25, %v4998_v15 }
 0x20d   : > { %v2603_v21 = vpop.f32.mrf.mxu0 }
 0x20e   : > { %v2678_v56 = vadd.f32 %v2601_v1, %v2480_v48 }
 0x210   : > { %2710 = vst [vmem:[%s4753_s5 + $0x10] sm:$0xff] %v2678_v56  ;;  %v2741_v23 = vadd.f32 %v2740_v39, %v2678_v56  ;;  %v2779_v63 = vmul.f32 %v2678_v56, %v2678_v56 }
 0x211   : > { %v2207_v9 = vpop.f32.mrf.mxu2 }
 0x212   : > { %v2810_v8 = vadd.f32 %v2809_v20, %v2779_v63  ;;  %v2283_v24 = vadd.f32 %v2207_v9, %v1902_v52  ;;  %v2405_v7 = vpop.f32.mrf.mxu3  ;;  %v2046_v20 = vrot.slane %v3748_v2, 5  ;;  %v5001_v52 = vld [vmem:[#allocation18_spill] sm:$0xff]  ;;  %v5003_v2 = vld [vmem:[#allocation19_spill] sm:$0xff] }
 0x213   : > { %v1829_v51 = vpop.f32.mrf.mxu1 }
 0x214   : > { %v2481_v1 = vadd.f32 %v2405_v7, %v2283_v24  ;;  %v1903_v13 = vadd.f32 %v1829_v51, %v5000_v28  ;;  %v2047_v56 = vsel %vm4538_vm5, %v2045_v61, %v2046_v20  ;;  %v3750_v61 = vld [vmem:[%s3976_s29 + $0xa8] sm:$0xf] }
 0x215   : > { %v2606_v4 = vpop.f32.mrf.mxu0 }
 0x216   : > { %v2679_v42 = vadd.f32 %v2603_v21, %v2481_v1  ;;  %1868 = vmatmul.bf16.gmra.mxu1 %v4999_v16  ;;  %2249 = vmatmul.bf16.gmra.mxu2 %v4733_v34 }
 0x217   : > { %2447 = vmatmul.bf16.gmra.mxu3 %v4757_v3 }
 0x218   : > { %2645 = vmatmul.bf16.gmra.mxu0 %v4774_v30  ;;  %2711 = vst [vmem:[%s4753_s5 + $0x18] sm:$0xff] %v2679_v42  ;;  %v2742_v22 = vadd.f32 %v2741_v23, %v2679_v42  ;;  %v2780_v39 = vmul.f32 %v2679_v42, %v2679_v42  ;;  %v2106_v23 = vunpack.c.l.b16 %v2047_v56  ;;  %v2050_v42 = vrot.slane %v3749_v57, 5 }
 0x219   : > { %v2210_v0 = vpop.f32.mrf.mxu2 }
 0x21a   : > { %v2811_v12 = vadd.f32 %v2810_v8, %v2780_v39  ;;  %v2284_v25 = vadd.f32 %v2210_v0, %v1903_v13  ;;  %v2408_v48 = vpop.f32.mrf.mxu3  ;;  %v4791_v1 = vpack.c.b16 %v2106_v23, %v2105_v26  ;;  %v2052_v39 = vrot.slane %v2050_v42, 4  ;;  %v3751_v0 = vld [vmem:[%s3976_s29 + $0xb0] sm:$0x1] }
 0x21b   : > { %v1831_v34 = vpop.f32.mrf.mxu1 }
 0x21c   : > { %v2482_v21 = vadd.f32 %v2408_v48, %v2284_v25  ;;  %v1904_v9 = vadd.f32 %v1831_v34, %v5001_v52 }
 0x21d   : > { %v2608_v33 = vpop.f32.mrf.mxu0 }
 0x21e   : > { %v2680_v59 = vadd.f32 %v2606_v4, %v2482_v21 }
 0x220   : > { %2712 = vst [vmem:[%s4753_s5 + $0x20] sm:$0xff] %v2680_v59  ;;  %v2743_v63 = vadd.f32 %v2742_v22, %v2680_v59  ;;  %v2781_v15 = vmul.f32 %v2680_v59, %v2680_v59  ;;  %v3370_v22 = vrot.slane %v3750_v61, 9 }
 0x221   : > { %v2212_v8 = vpop.f32.mrf.mxu2 }
 0x222   : > { %v2812_v24 = vadd.f32 %v2811_v12, %v2781_v15  ;;  %v2285_v7 = vadd.f32 %v2212_v8, %v1904_v9  ;;  %v2410_v51 = vpop.f32.mrf.mxu3  ;;  %v2053_v12 = vrot.slane %v3751_v0, 5  ;;  %v2051_v56 = vsel %vm4538_vm5, %v3370_v22, %v2050_v42  ;;  %v5004_v9 = vld [vmem:[#allocation21_spill] sm:$0xff]  ;;  %v3752_v42 = vld [vmem:[%s3976_s29 + $0xb8] sm:$0xf]  ;;  %v3753_v22 = vld [vmem:[%s3976_s29 + $0xb4] sm:$0xf] }
 0x223   : > { %v1834_v17 = vpop.f32.mrf.mxu1  ;;  %v2107_v23 = vunpack.c.l.b16 %v2051_v56 }
 0x224   : > { %v2483_v4 = vadd.f32 %v2410_v51, %v2285_v7  ;;  %v1905_v20 = vadd.f32 %v1834_v17, %v5003_v2  ;;  %v2054_v59 = vsel %vm4538_vm5, %v2052_v39, %v2053_v12  ;;  %v3371_v39 = vrot.slane %v3753_v22, 9  ;;  %v3754_v12 = vld [vmem:[%s3976_s29 + $0xbc] sm:$0x1]  ;;  %v3756_v22 = vld [vmem:[%s3976_s29 + $0xc0] sm:$0xf] }
 0x225   : > { %v2611_v16 = vpop.f32.mrf.mxu0 }
 0x226   : > { %v2681_v47 = vadd.f32 %v2608_v33, %v2483_v4  ;;  %1873 = vmatmul.bf16.gmra.mxu1 %v5002_v18  ;;  %2254 = vmatmul.bf16.gmra.mxu2 %v4757_v3 }
 0x227   : > { %2452 = vmatmul.bf16.gmra.mxu3 %v4774_v30 }
 0x228   : > { %2650 = vmatmul.bf16.gmra.mxu0 %v4791_v1  ;;  %2713 = vst [vmem:[%s4753_s5 + $0x28] sm:$0xff] %v2681_v47  ;;  %v2744_v28 = vadd.f32 %v2743_v63, %v2681_v47  ;;  %v2782_v13 = vmul.f32 %v2681_v47, %v2681_v47  ;;  %v2108_v63 = vunpack.c.l.b16 %v2054_v59  ;;  %v2057_v47 = vrot.slane %v3752_v42, 5  ;;  %v3755_v42 = vld [vmem:[%s3976_s29 + $0xc4] sm:$0xf] }
 0x229   : > { %v2215_v25 = vpop.f32.mrf.mxu2 }
 0x22a   : > { %v2813_v48 = vadd.f32 %v2812_v24, %v2782_v13  ;;  %v2286_v34 = vadd.f32 %v2215_v25, %v1905_v20  ;;  %v2413_v21 = vpop.f32.mrf.mxu3  ;;  %v4808_v4 = vpack.c.b16 %v2108_v63, %v2107_v23  ;;  %v5005_v20 = vld [vmem:[#allocation22_spill] sm:$0xff]  ;;  %v2060_v25 = vrot.slane %v3754_v12, 5  ;;  %v3757_v12 = vld [vmem:[%s3976_s29 + $0xc8] sm:$0x1] }
 0x22b   : > { %v1836_v3 = vpop.f32.mrf.mxu1 }
 0x22c   : > { %v2484_v33 = vadd.f32 %v2413_v21, %v2286_v34  ;;  %v1906_v8 = vadd.f32 %v1836_v3, %v5004_v9 }
 0x22d   : > { %v2613_v10 = vpop.f32.mrf.mxu0 }
 0x22e   : > { %v2682_v26 = vadd.f32 %v2611_v16, %v2484_v33 }
 0x230   : > { %2714 = vst [vmem:[%s4753_s5 + $0x30] sm:$0xff] %v2682_v26  ;;  %v2745_v15 = vadd.f32 %v2744_v28, %v2682_v26  ;;  %v2783_v52 = vmul.f32 %v2682_v26, %v2682_v26  ;;  %v2059_v28 = vrot.slane %v2057_v47, 4 }
 0x231   : > { %v2217_v24 = vpop.f32.mrf.mxu2 }
 0x232   : > { %v2814_v7 = vadd.f32 %v2813_v48, %v2783_v52  ;;  %v2287_v51 = vadd.f32 %v2217_v24, %v1906_v8  ;;  %v2415_v17 = vpop.f32.mrf.mxu3  ;;  %v2061_v56 = vsel %vm4538_vm5, %v2059_v28, %v2060_v25  ;;  %v5006_v52 = vld [vmem:[#allocation23_spill] sm:$0xff]  ;;  %v2318_v25 = vrot.slane %v3757_v12, 5 }
 0x233   : > { %v1839_v57 = vpop.f32.mrf.mxu1  ;;  %v2110_v23 = vunpack.c.l.b16 %v2061_v56 }
 0x234   : > { %v2485_v16 = vadd.f32 %v2415_v17, %v2287_v51  ;;  %v1907_v0 = vadd.f32 %v1839_v57, %v5005_v20 }
 0x235   : > { %v2616_v18 = vpop.f32.mrf.mxu0 }
 0x236   : > { %v2683_v61 = vadd.f32 %v2613_v10, %v2485_v16  ;;  %1878 = vmatmul.bf16.gmra.mxu1 %v4505_v32  ;;  %2259 = vmatmul.bf16.gmra.mxu2 %v4774_v30  ;;  %v2058_v10 = vsel %vm4538_vm5, %v3371_v39, %v2057_v47  ;;  %v2315_v47 = vrot.slane %v3755_v42, 5  ;;  %v3420_v39 = vrot.slane %v3756_v22, 9  ;;  %v264_v42 = vld [vmem:[%s3976_s29 + $0xd4] sm:$0x1] }
 0x237   : > { %2457 = vmatmul.bf16.gmra.mxu3 %v4791_v1  ;;  %v2109_v26 = vunpack.c.l.b16 %v2058_v10 }
 0x238   : > { %2655 = vmatmul.bf16.gmra.mxu0 %v4808_v4  ;;  %2715 = vst [vmem:[%s4753_s5 + $0x38] sm:$0xff] %v2683_v61  ;;  %v2746_v13 = vadd.f32 %v2745_v15, %v2683_v61  ;;  %v2784_v2 = vmul.f32 %v2683_v61, %v2683_v61  ;;  %v2317_v28 = vrot.slane %v2315_v47, 4 }
 0x239   : > { %v2220_v48 = vpop.f32.mrf.mxu2  ;;  %v4825_v57 = vpack.c.b16 %v2110_v23, %v2109_v26 }
 0x23a   : > { %v2815_v34 = vadd.f32 %v2814_v7, %v2784_v2  ;;  %v2288_v32 = vadd.f32 %v2220_v48, %v1907_v0  ;;  %v2418_v21 = vpop.f32.mrf.mxu3  ;;  %v4840_v48 = vld [vmem:[%s3976_s29 + $0xd0] sm:$0xf]  ;;  %v2319_v26 = vsel %vm4538_vm5, %v2317_v28, %v2318_v25 }
 0x23b   : > { %v1841_v30 = vpop.f32.mrf.mxu1  ;;  %v1731_v10 = vshrl.u32 %v4840_v48, 16  ;;  %v2513_v12 = vrot.slane %v4840_v48, 5 }
 0x23c   : > { %v2486_v3 = vadd.f32 %v2418_v21, %v2288_v32  ;;  %v1908_v9 = vadd.f32 %v1841_v30, %v5006_v52 }
 0x23d   : > { %v2618_v33 = vpop.f32.mrf.mxu0 }
 0x23e   : > { %v2684_v59 = vadd.f32 %v2616_v18, %v2486_v3 }
 0x240   : > { %2716 = vst [vmem:[%s4753_s5 + $0x40] sm:$0xff] %v2684_v59  ;;  %v2747_v63 = vadd.f32 %v2746_v13, %v2684_v59  ;;  %v2785_v15 = vmul.f32 %v2684_v59, %v2684_v59  ;;  %v4834_v13 = vld [vmem:[%s3976_s29 + $0xcc] sm:$0xf]  ;;  %v2316_v59 = vsel %vm4538_vm5, %v3420_v39, %v2315_v47  ;;  %s3615_s29 = sshll.u32 %s3860_s15, 8 }
 0x241   : > { %v2222_v8 = vpop.f32.mrf.mxu2  ;;  %v1718_v21 = vshrl.u32 %v4834_v13, 16  ;;  %v1721_v30 = vshll.u32 %v4834_v13, 16  ;;  %v2337_v52 = vunpack.c.l.b16 %v2316_v59  ;;  %s2869_s8 = scalar_lea.hbm %s4964_s2, %s3615_s29 }
 0x242   : > { %v2816_v24 = vadd.f32 %v2815_v34, %v2785_v15  ;;  %v2289_v7 = vadd.f32 %v2222_v8, %v1908_v9  ;;  %v2420_v51 = vpop.f32.mrf.mxu3  ;;  %v2338_v9 = vunpack.c.l.b16 %v2319_v26  ;;  %s2872_s10 = sshll.u32 %s2869_s8, 4  ;;  %s2873_s10 = int_to_ptr.hbm [resolvable:$true] %s2872_s10 }
 0x243   : > { %v1844_v17 = vpop.f32.mrf.mxu1  ;;  %v1723_v15 = vrot.slane %v1721_v30, 5  ;;  %s3772_s18 = sshra.s32 %s2873_s10, 4  ;;  %s3773_s18 = int_to_ptr.hbm [resolvable:$true] %s3772_s18 }
 0x244   : > { %v2487_v16 = vadd.f32 %v2420_v51, %v2289_v7  ;;  %v1909_v0 = vadd.f32 %v1844_v17, %v4531_v43  ;;  %v2339_v28 = vpack.c.b16 %v2338_v9, %v2337_v52  ;;  %s3774_s19 = scalar_lea.hbm %s3773_s18, 256  ;;  %p3779_p1 = scmp.lt.s32.totalorder %s3773_s18, %s4964_s2 }
 0x245   : > { %v2621_v18 = vpop.f32.mrf.mxu0  ;;  %p3775_p12 = scmp.ne.s32.totalorder %s3773_s18, %s3774_s19  ;;  %p3780_p2 = scmp.lt.s32.totalorder %s3778_s26, %s3774_s19 }
 0x246   : > { %v2685_v61 = vadd.f32 %v2618_v33, %v2487_v16  ;;  %1883 = vmatmul.bf16.gmra.mxu1 %v4536_v31  ;;  %2264 = vmatmul.bf16.gmra.mxu2 %v4791_v1  ;;  %v1727_v33 = vshll.u32 %v4840_v48, 16 }
 0x247   : > { %2462 = vmatmul.bf16.gmra.mxu3 %v4808_v4  ;;  %p3776_p13 = pnand %p3775_p12, %p3932_p4  ;;  %p3781_p3 = por %p3780_p2, %p3779_p1 }
 0x248   : > { %2660 = vmatmul.bf16.gmra.mxu0 %v4825_v57  ;;  %2717 = vst [vmem:[%s4753_s5 + $0x48] sm:$0xff] %v2685_v61  ;;  %v2748_v2 = vadd.f32 %v2747_v63, %v2685_v61  ;;  %v2786_v20 = vmul.f32 %v2685_v61, %v2685_v61  ;;  %v1720_v63 = vrot.slane %v1718_v21, 4  ;;  %v1729_v8 = vrot.slane %v1727_v33, 5 }
 0x249   : > { %v2225_v31 = vpop.f32.mrf.mxu2  ;;  %v2515_v21 = vrot.slane %v2513_v12, 4  ;;  %v2516_v33 = vrot.slane %v264_v42, 5  ;;  %p3777_p0 = pneg %p3776_p13 }
 0x24a   : > { %v2817_v1 = vadd.f32 %v2816_v24, %v2786_v20  ;;  %v2290_v34 = vadd.f32 %v2225_v31, %v1909_v0  ;;  %v2423_v32 = vpop.f32.mrf.mxu3  ;;  %v1733_v24 = vrot.slane %v1731_v10, 4  ;;  %v1724_v39 = vor.u32 %v1723_v15, %v1720_v63 }
 0x24b   : > { %v1846_v3 = vpop.f32.mrf.mxu1  ;;  %v1737_v0 = vshll.u32 %v264_v42, 16  ;;  %p3782_p5 = pnand %p3781_p3, %p3777_p0 }
 0x24c   : > { %v2488_v43 = vadd.f32 %v2423_v32, %v2290_v34  ;;  %v1910_v17 = vadd.f32 %v1846_v3, %v4558_v38  ;;  %v1725_v38 = vrot.slane %v1724_v39, 4  ;;  %v3469_v32 = vrot.slane %v4834_v13, 9 }
 0x24d   : > { %v2623_v56 = vpop.f32.mrf.mxu0 }
 0x24e   : > { %v2686_v23 = vadd.f32 %v2621_v18, %v2488_v43  ;;  %v1734_v18 = vor.u32 %v1733_v24, %v1729_v8  ;;  %v1730_v59 = vsel %vm4144_vm2, %v1725_v38, %v1729_v8  ;;  %v2514_v63 = vsel %vm4538_vm5, %v3469_v32, %v2513_v12 }
 0x24f   : > { %v1758_v52 = vunpack.c.l.b16 %v1730_v59  ;;  %v2535_v24 = vunpack.c.l.b16 %v2514_v63 }
 0x250   : > { %2718 = vst [vmem:[%s4753_s5 + $0x50] sm:$0xff] %v2686_v23  ;;  %v2749_v7 = vadd.f32 %v2748_v2, %v2686_v23  ;;  %v2787_v51 = vmul.f32 %v2686_v23, %v2686_v23  ;;  %v1735_v2 = vrot.slane %v1734_v18, 4 }
 0x251   : > { %v2227_v16 = vpop.f32.mrf.mxu2 }
 0x252   : > { %v2818_v61 = vadd.f32 %v2817_v1, %v2787_v51  ;;  %v2291_v22 = vadd.f32 %v2227_v16, %v1910_v17  ;;  %v2425_v47 = vpop.f32.mrf.mxu3  ;;  %v1739_v1 = vrot.slane %v1737_v0, 5 }
 0x253   : > { %v1849_v20 = vpop.f32.mrf.mxu1 }
 0x254   : > { %v2489_v25 = vadd.f32 %v2425_v47, %v2291_v22  ;;  %v1911_v48 = vadd.f32 %v1849_v20, %v4569_v41  ;;  %v1740_v26 = vsel %vm4144_vm2, %v1735_v2, %v1739_v1  ;;  %v2517_v41 = vsel %vm4538_vm5, %v2515_v21, %v2516_v33 }
 0x255   : > { %v2626_v31 = vpop.f32.mrf.mxu0  ;;  %v1759_v9 = vunpack.c.l.b16 %v1740_v26 }
 0x256   : > { %v2687_v34 = vadd.f32 %v2623_v56, %v2489_v25  ;;  %1888 = vmatmul.bf16.gmra.mxu1 %v4573_v19  ;;  %2269 = vmatmul.bf16.gmra.mxu2 %v4808_v4 }
 0x257   : > { %2467 = vmatmul.bf16.gmra.mxu3 %v4825_v57  ;;  %v1760_v22 = vpack.c.b16 %v1759_v9, %v1758_v52 }
 0x258   : > { %2665 = vmatmul.bf16.gmra.mxu0 %v2339_v28  ;;  %2719 = vst [vmem:[%s4753_s5 + $0x58] sm:$0xff] %v2687_v34  ;;  %v2750_v30 = vadd.f32 %v2749_v7, %v2687_v34  ;;  %v2788_v3 = vmul.f32 %v2687_v34, %v2687_v34  ;;  %v2536_v7 = vunpack.c.l.b16 %v2517_v41 }
 0x259   : > { %v2230_v10 = vpop.f32.mrf.mxu2 }
 0x25a   : > { %v2819_v19 = vadd.f32 %v2818_v61, %v2788_v3  ;;  %v2292_v43 = vadd.f32 %v2230_v10, %v1911_v48  ;;  %v2428_v4 = vpop.f32.mrf.mxu3  ;;  %v2537_v39 = vpack.c.b16 %v2536_v7, %v2535_v24 }
 0x25b   : > { %v1851_v56 = vpop.f32.mrf.mxu1 }
 0x25c   : > { %v2490_v13 = vadd.f32 %v2428_v4, %v2292_v43  ;;  %v1912_v36 = vadd.f32 %v1851_v56, %v4576_v6 }
 0x25d   : > { %v2628_v23 = vpop.f32.mrf.mxu0 }
 0x25e   : > { %v2688_v15 = vadd.f32 %v2626_v31, %v2490_v13 }
 0x260   : > { %2720 = vst [vmem:[%s4753_s5 + $0x60] sm:$0xff] %v2688_v15  ;;  %v2751_v51 = vadd.f32 %v2750_v30, %v2688_v15  ;;  %v2789_v17 = vmul.f32 %v2688_v15, %v2688_v15 }
 0x261   : > { %v2232_v8 = vpop.f32.mrf.mxu2 }
 0x262   : > { %v2820_v42 = vadd.f32 %v2819_v19, %v2789_v17  ;;  %v2293_v16 = vadd.f32 %v2232_v8, %v1912_v36  ;;  %v2430_v61 = vpop.f32.mrf.mxu3 }
 0x263   : > { %v1854_v47 = vpop.f32.mrf.mxu1 }
 0x264   : > { %v2491_v60 = vadd.f32 %v2430_v61, %v2293_v16  ;;  %v1913_v6 = vadd.f32 %v1854_v47, %v4581_v55 }
 0x265   : > { %v2631_v20 = vpop.f32.mrf.mxu0 }
 0x266   : > { %v2689_v18 = vadd.f32 %v2628_v23, %v2491_v60  ;;  %1893 = vmatmul.bf16.gmra.mxu1 %v1760_v22  ;;  %2274 = vmatmul.bf16.gmra.mxu2 %v4825_v57 }
 0x267   : > { %2472 = vmatmul.bf16.gmra.mxu3 %v2339_v28 }
 0x268   : > { %2670 = vmatmul.bf16.gmra.mxu0 %v2537_v39  ;;  %2721 = vst [vmem:[%s4753_s5 + $0x68] sm:$0xff] %v2689_v18  ;;  %v2752_v0 = vadd.f32 %v2751_v51, %v2689_v18  ;;  %v2790_v12 = vmul.f32 %v2689_v18, %v2689_v18 }
 0x269   : > { %v2235_v25 = vpop.f32.mrf.mxu2 }
 0x26a   : > { %v2821_v31 = vadd.f32 %v2820_v42, %v2790_v12  ;;  %v2294_v34 = vadd.f32 %v2235_v25, %v1913_v6  ;;  %v2433_v38 = vpop.f32.mrf.mxu3 }
 0x26b   : > { %v1856_v2 = vpop.f32.mrf.mxu1 }
 0x26c   : > { %v2492_v1 = vadd.f32 %v2433_v38, %v2294_v34  ;;  %v1914_v57 = vadd.f32 %v1856_v2, %v4586_v58 }
 0x26d   : > { %v2633_v32 = vpop.f32.mrf.mxu0 }
 0x26e   : > { %v2690_v21 = vadd.f32 %v2631_v20, %v2492_v1 }
 0x270   : > { %2722 = vst [vmem:[%s4753_s5 + $0x70] sm:$0xff] %v2690_v21  ;;  %v2753_v30 = vadd.f32 %v2752_v0, %v2690_v21  ;;  %v2791_v3 = vmul.f32 %v2690_v21, %v2690_v21 }
 0x271   : > { %v2237_v28 = vpop.f32.mrf.mxu2 }
 0x272   : > { %v2822_v48 = vadd.f32 %v2821_v31, %v2791_v3  ;;  %v2295_v33 = vadd.f32 %v2237_v28, %v1914_v57  ;;  %v2435_v10 = vpop.f32.mrf.mxu3 }
 0x273   : > { %v1859_v19 = vpop.f32.mrf.mxu1 }
 0x274   : > { %v2493_v55 = vadd.f32 %v2435_v10, %v2295_v33  ;;  %v1915_v26 = vadd.f32 %v1859_v19, %v4597_v40 }
 0x275   : > { %v2636_v43 = vpop.f32.mrf.mxu0 }
 0x276   : > { %v2691_v4 = vadd.f32 %v2633_v32, %v2493_v55 }
 0x278   : > { %2723 = vst [vmem:[%s4753_s5 + $0x78] sm:$0xff] %v2691_v4  ;;  %v2754_v56 = vadd.f32 %v2753_v30, %v2691_v4  ;;  %v2792_v59 = vmul.f32 %v2691_v4, %v2691_v4 }
 0x279   : > { %v2240_v13 = vpop.f32.mrf.mxu2 }
 0x27a   : > { %v2823_v23 = vadd.f32 %v2822_v48, %v2792_v59  ;;  %v2296_v63 = vadd.f32 %v2240_v13, %v1915_v26  ;;  %v2438_v41 = vpop.f32.mrf.mxu3 }
 0x27b   : > { %v1861_v15 = vpop.f32.mrf.mxu1 }
 0x27c   : > { %v2494_v58 = vadd.f32 %v2438_v41, %v2296_v63  ;;  %v1916_v51 = vadd.f32 %v1861_v15, %v4605_v11 }
 0x27d   : > { %v2638_v52 = vpop.f32.mrf.mxu0 }
 0x27e   : > { %v2692_v9 = vadd.f32 %v2636_v43, %v2494_v58 }
 0x280   : > { %2724 = vst [vmem:[%s4753_s5 + $0x80] sm:$0xff] %v2692_v9  ;;  %v2755_v24 = vadd.f32 %v2754_v56, %v2692_v9  ;;  %v2793_v7 = vmul.f32 %v2692_v9, %v2692_v9 }
 0x281   : > { %v2242_v17 = vpop.f32.mrf.mxu2 }
 0x282   : > { %v2824_v36 = vadd.f32 %v2823_v23, %v2793_v7  ;;  %v2297_v8 = vadd.f32 %v2242_v17, %v1916_v51  ;;  %v2440_v42 = vpop.f32.mrf.mxu3 }
 0x283   : > { %v1864_v16 = vpop.f32.mrf.mxu1 }
 0x284   : > { %v2495_v40 = vadd.f32 %v2440_v42, %v2297_v8  ;;  %v1917_v60 = vadd.f32 %v1864_v16, %v4616_v62 }
 0x285   : > { %v2641_v61 = vpop.f32.mrf.mxu0 }
 0x286   : > { %v2693_v22 = vadd.f32 %v2638_v52, %v2495_v40 }
 0x288   : > { %2725 = vst [vmem:[%s4753_s5 + $0x88] sm:$0xff] %v2693_v22  ;;  %v2756_v47 = vadd.f32 %v2755_v24, %v2693_v22  ;;  %v2794_v39 = vmul.f32 %v2693_v22, %v2693_v22 }
 0x289   : > { %v2245_v20 = vpop.f32.mrf.mxu2 }
 0x28a   : > { %v2825_v18 = vadd.f32 %v2824_v36, %v2794_v39  ;;  %v2298_v0 = vadd.f32 %v2245_v20, %v1917_v60  ;;  %v2443_v12 = vpop.f32.mrf.mxu3 }
 0x28b   : > { %v1866_v6 = vpop.f32.mrf.mxu1 }
 0x28c   : > { %v2496_v11 = vadd.f32 %v2443_v12, %v2298_v0  ;;  %v1918_v2 = vadd.f32 %v1866_v6, %v4624_v54 }
 0x28d   : > { %v2643_v25 = vpop.f32.mrf.mxu0 }
 0x28e   : > { %v2694_v31 = vadd.f32 %v2641_v61, %v2496_v11 }
 0x290   : > { %2726 = vst [vmem:[%s4753_s5 + $0x90] sm:$0xff] %v2694_v31  ;;  %v2757_v34 = vadd.f32 %v2756_v47, %v2694_v31  ;;  %v2795_v38 = vmul.f32 %v2694_v31, %v2694_v31 }
 0x291   : > { %v2247_v1 = vpop.f32.mrf.mxu2 }
 0x292   : > { %v2826_v32 = vadd.f32 %v2825_v18, %v2795_v38  ;;  %v2299_v21 = vadd.f32 %v2247_v1, %v1918_v2  ;;  %v2445_v30 = vpop.f32.mrf.mxu3 }
 0x293   : > { %v1869_v3 = vpop.f32.mrf.mxu1 }
 0x294   : > { %v2497_v62 = vadd.f32 %v2445_v30, %v2299_v21  ;;  %v1919_v10 = vadd.f32 %v1869_v3, %v4635_v50 }
 0x295   : > { %v2646_v57 = vpop.f32.mrf.mxu0 }
 0x296   : > { %v2695_v28 = vadd.f32 %v2643_v25, %v2497_v62 }
 0x298   : > { %2727 = vst [vmem:[%s4753_s5 + $0x98] sm:$0xff] %v2695_v28  ;;  %v2758_v48 = vadd.f32 %v2757_v34, %v2695_v28  ;;  %v2796_v33 = vmul.f32 %v2695_v28, %v2695_v28 }
 0x299   : > { %v2250_v19 = vpop.f32.mrf.mxu2 }
 0x29a   : > { %v2827_v55 = vadd.f32 %v2826_v32, %v2796_v33  ;;  %v2300_v43 = vadd.f32 %v2250_v19, %v1919_v10  ;;  %v2448_v4 = vpop.f32.mrf.mxu3 }
 0x29b   : > { %v1871_v56 = vpop.f32.mrf.mxu1 }
 0x29c   : > { %v2498_v54 = vadd.f32 %v2448_v4, %v2300_v43  ;;  %v1920_v63 = vadd.f32 %v1871_v56, %v4643_v46 }
 0x29d   : > { %v2648_v59 = vpop.f32.mrf.mxu0 }
 0x29e   : > { %v2696_v26 = vadd.f32 %v2646_v57, %v2498_v54 }
 0x2a0   : > { %2728 = vst [vmem:[%s4753_s5 + $0xa0] sm:$0xff] %v2696_v26  ;;  %v2759_v13 = vadd.f32 %v2758_v48, %v2696_v26  ;;  %v2797_v23 = vmul.f32 %v2696_v26, %v2696_v26 }
 0x2a1   : > { %v2252_v41 = vpop.f32.mrf.mxu2 }
 0x2a2   : > { %v2828_v15 = vadd.f32 %v2827_v55, %v2797_v23  ;;  %v2301_v58 = vadd.f32 %v2252_v41, %v1920_v63  ;;  %v2450_v52 = vpop.f32.mrf.mxu3 }
 0x2a3   : > { %v1874_v9 = vpop.f32.mrf.mxu1 }
 0x2a4   : > { %v2499_v50 = vadd.f32 %v2450_v52, %v2301_v58  ;;  %v1921_v36 = vadd.f32 %v1874_v9, %v4654_v45 }
 0x2a5   : > { %v2651_v24 = vpop.f32.mrf.mxu0 }
 0x2a6   : > { %v2697_v7 = vadd.f32 %v2648_v59, %v2499_v50 }
 0x2a8   : > { %2729 = vst [vmem:[%s4753_s5 + $0xa8] sm:$0xff] %v2697_v7  ;;  %v2760_v51 = vadd.f32 %v2759_v13, %v2697_v7  ;;  %v2798_v17 = vmul.f32 %v2697_v7, %v2697_v7 }
 0x2a9   : > { %v2255_v8 = vpop.f32.mrf.mxu2 }
 0x2aa   : > { %v2829_v42 = vadd.f32 %v2828_v15, %v2798_v17  ;;  %v2302_v16 = vadd.f32 %v2255_v8, %v1921_v36  ;;  %v2453_v40 = vpop.f32.mrf.mxu3 }
 0x2ab   : > { %v1876_v61 = vpop.f32.mrf.mxu1 }
 0x2ac   : > { %v2500_v46 = vadd.f32 %v2453_v40, %v2302_v16  ;;  %v1922_v20 = vadd.f32 %v1876_v61, %v4662_v53 }
 0x2ad   : > { %v2653_v22 = vpop.f32.mrf.mxu0 }
 0x2ae   : > { %v2698_v47 = vadd.f32 %v2651_v24, %v2500_v46 }
 0x2b0   : > { %2730 = vst [vmem:[%s4753_s5 + $0xb0] sm:$0xff] %v2698_v47  ;;  %v2761_v39 = vadd.f32 %v2760_v51, %v2698_v47  ;;  %v2799_v60 = vmul.f32 %v2698_v47, %v2698_v47 }
 0x2b1   : > { %v2257_v18 = vpop.f32.mrf.mxu2 }
 0x2b2   : > { %v2830_v0 = vadd.f32 %v2829_v42, %v2799_v60  ;;  %v2303_v12 = vadd.f32 %v2257_v18, %v1922_v20  ;;  %v2455_v6 = vpop.f32.mrf.mxu3 }
 0x2b3   : > { %v1879_v11 = vpop.f32.mrf.mxu1 }
 0x2b4   : > { %v2501_v45 = vadd.f32 %v2455_v6, %v2303_v12  ;;  %v1923_v2 = vadd.f32 %v1879_v11, %v4673_v14 }
 0x2b5   : > { %v2656_v25 = vpop.f32.mrf.mxu0 }
 0x2b6   : > { %v2699_v31 = vadd.f32 %v2653_v22, %v2501_v45 }
 0x2b8   : > { %2731 = vst [vmem:[%s4753_s5 + $0xb8] sm:$0xff] %v2699_v31  ;;  %v2762_v34 = vadd.f32 %v2761_v39, %v2699_v31  ;;  %v2800_v38 = vmul.f32 %v2699_v31, %v2699_v31 }
 0x2b9   : > { %v2260_v1 = vpop.f32.mrf.mxu2 }
 0x2ba   : > { %v2831_v32 = vadd.f32 %v2830_v0, %v2800_v38  ;;  %v2304_v21 = vadd.f32 %v2260_v1, %v1923_v2  ;;  %v2458_v30 = vpop.f32.mrf.mxu3 }
 0x2bb   : > { %v1881_v3 = vpop.f32.mrf.mxu1 }
 0x2bc   : > { %v2502_v53 = vadd.f32 %v2458_v30, %v2304_v21  ;;  %v1924_v33 = vadd.f32 %v1881_v3, %v4681_v37 }
 0x2bd   : > { %v2658_v62 = vpop.f32.mrf.mxu0 }
 0x2be   : > { %v2700_v57 = vadd.f32 %v2656_v25, %v2502_v53 }
 0x2c0   : > { %2732 = vst [vmem:[%s4753_s5 + $0xc0] sm:$0xff] %v2700_v57  ;;  %v2763_v28 = vadd.f32 %v2762_v34, %v2700_v57  ;;  %v2801_v48 = vmul.f32 %v2700_v57, %v2700_v57 }
 0x2c1   : > { %v2262_v10 = vpop.f32.mrf.mxu2 }
 0x2c2   : > { %v2832_v19 = vadd.f32 %v2831_v32, %v2801_v48  ;;  %v2305_v55 = vadd.f32 %v2262_v10, %v1924_v33  ;;  %v2460_v43 = vpop.f32.mrf.mxu3 }
 0x2c3   : > { %v1884_v4 = vpop.f32.mrf.mxu1 }
 0x2c4   : > { %v2503_v14 = vadd.f32 %v2460_v43, %v2305_v55  ;;  %v1925_v13 = vadd.f32 %v1884_v4, %v4692_v35 }
 0x2c5   : > { %v2661_v56 = vpop.f32.mrf.mxu0 }
 0x2c6   : > { %v2701_v54 = vadd.f32 %v2658_v62, %v2503_v14 }
 0x2c8   : > { %2733 = vst [vmem:[%s4753_s5 + $0xc8] sm:$0xff] %v2701_v54  ;;  %v2764_v59 = vadd.f32 %v2763_v28, %v2701_v54  ;;  %v2802_v26 = vmul.f32 %v2701_v54, %v2701_v54 }
 0x2c9   : > { %v2265_v23 = vpop.f32.mrf.mxu2 }
 0x2ca   : > { %v2833_v63 = vadd.f32 %v2832_v19, %v2802_v26  ;;  %v2306_v41 = vadd.f32 %v2265_v23, %v1925_v13  ;;  %v2463_v15 = vpop.f32.mrf.mxu3 }
 0x2cb   : > { %v1886_v58 = vpop.f32.mrf.mxu1 }
 0x2cc   : > { %v2504_v37 = vadd.f32 %v2463_v15, %v2306_v41  ;;  %v1926_v7 = vadd.f32 %v1886_v58, %v4700_v49 }
 0x2cd   : > { %v2663_v52 = vpop.f32.mrf.mxu0 }
 0x2ce   : > { %v2702_v9 = vadd.f32 %v2661_v56, %v2504_v37 }
 0x2d0   : > { %2734 = vst [vmem:[%s4753_s5 + $0xd0] sm:$0xff] %v2702_v9  ;;  %v2765_v50 = vadd.f32 %v2764_v59, %v2702_v9  ;;  %v2803_v24 = vmul.f32 %v2702_v9, %v2702_v9 }
 0x2d1   : > { %v2267_v51 = vpop.f32.mrf.mxu2 }
 0x2d2   : > { %v2834_v17 = vadd.f32 %v2833_v63, %v2803_v24  ;;  %v2307_v36 = vadd.f32 %v2267_v51, %v1926_v7  ;;  %v2465_v8 = vpop.f32.mrf.mxu3 }
 0x2d3   : > { %v1889_v35 = vpop.f32.mrf.mxu1 }
 0x2d4   : > { %v2505_v42 = vadd.f32 %v2465_v8, %v2307_v36  ;;  %v1927_v22 = vadd.f32 %v1889_v35, %v4711_v5 }
 0x2d5   : > { %v2666_v40 = vpop.f32.mrf.mxu0 }
 0x2d6   : > { %v2703_v16 = vadd.f32 %v2663_v52, %v2505_v42 }
 0x2d8   : > { %2735 = vst [vmem:[%s4753_s5 + $0xd8] sm:$0xff] %v2703_v16  ;;  %v2766_v61 = vadd.f32 %v2765_v50, %v2703_v16  ;;  %v2804_v46 = vmul.f32 %v2703_v16, %v2703_v16 }
 0x2d9   : > { %v2270_v47 = vpop.f32.mrf.mxu2 }
 0x2da   : > { %v2835_v39 = vadd.f32 %v2834_v17, %v2804_v46  ;;  %v2308_v60 = vadd.f32 %v2270_v47, %v1927_v22  ;;  %v2468_v20 = vpop.f32.mrf.mxu3 }
 0x2db   : > { %v1891_v49 = vpop.f32.mrf.mxu1 }
 0x2dc   : > { %v2506_v18 = vadd.f32 %v2468_v20, %v2308_v60  ;;  %v1928_v11 = vadd.f32 %v1891_v49, %v4719_v29 }
 0x2dd   : > { %v2668_v45 = vpop.f32.mrf.mxu0 }
 0x2de   : > { %v2704_v0 = vadd.f32 %v2666_v40, %v2506_v18 }
 0x2e0   : > { %2736 = vst [vmem:[%s4753_s5 + $0xe0] sm:$0xff] %v2704_v0  ;;  %v2767_v12 = vadd.f32 %v2766_v61, %v2704_v0  ;;  %v2805_v6 = vmul.f32 %v2704_v0, %v2704_v0 }
 0x2e1   : > { %v2272_v25 = vpop.f32.mrf.mxu2 }
 0x2e2   : > { %v2836_v31 = vadd.f32 %v2835_v39, %v2805_v6  ;;  %v2309_v34 = vadd.f32 %v2272_v25, %v1928_v11  ;;  %v2470_v38 = vpop.f32.mrf.mxu3 }
 0x2e3   : > { %v1894_v5 = vpop.f32.mrf.mxu1 }
 0x2e4   : > { %v2507_v2 = vadd.f32 %v2470_v38, %v2309_v34  ;;  %v1929_v30 = vadd.f32 %v1894_v5, %v4730_v27 }
 0x2e5   : > { %v2671_v57 = vpop.f32.mrf.mxu0 }
 0x2e6   : > { %v2705_v1 = vadd.f32 %v2668_v45, %v2507_v2 }
 0x2e8   : > { %2737 = vst [vmem:[%s4753_s5 + $0xe8] sm:$0xff] %v2705_v1  ;;  %v2768_v32 = vadd.f32 %v2767_v12, %v2705_v1  ;;  %v2806_v21 = vmul.f32 %v2705_v1, %v2705_v1 }
 0x2e9   : > { %v2275_v3 = vpop.f32.mrf.mxu2 }
 0x2ea   : > { %v2837_v53 = vadd.f32 %v2836_v31, %v2806_v21  ;;  %v2310_v62 = vadd.f32 %v2275_v3, %v1929_v30  ;;  %v2473_v29 = vpop.f32.mrf.mxu3 }
 0x2eb   : > { %v1896_v48 = vpop.f32.mrf.mxu1 }
 0x2ec   : > { %v2508_v28 = vadd.f32 %v2473_v29, %v2310_v62  ;;  %v1930_v27 = vadd.f32 %v1896_v48, %v4738_v44 }
 0x2ed   : > { %v2673_v54 = vpop.f32.mrf.mxu0 }
 0x2ee   : > { %v2706_v33 = vadd.f32 %v2671_v57, %v2508_v28 }
 0x2f0   : > { %2738 = vst [vmem:[%s4753_s5 + $0xf0] sm:$0xff] %v2706_v33  ;;  %v2769_v10 = vadd.f32 %v2768_v32, %v2706_v33  ;;  %v2807_v19 = vmul.f32 %v2706_v33, %v2706_v33 }
 0x2f1   : > { %v2277_v55 = vpop.f32.mrf.mxu2 }
 0x2f2   : > { %v2838_v43 = vadd.f32 %v2837_v53, %v2807_v19  ;;  %v2311_v4 = vadd.f32 %v2277_v55, %v1930_v27  ;;  %v2475_v14 = vpop.f32.mrf.mxu3 }
 0x2f4   : > { %v2509_v56 = vadd.f32 %v2475_v14, %v2311_v4 }
 0x2f6   : > { %v2707_v59 = vadd.f32 %v2673_v54, %v2509_v56 }
 0x2f8   : > { %2739 = vst [vmem:[%s4753_s5 + $0xf8] sm:$0xff] %v2707_v59  ;;  %v2770_v26 = vadd.f32 %v2769_v10, %v2707_v59  ;;  %v2808_v13 = vmul.f32 %v2707_v59, %v2707_v59 }
 0x2f9   : > { %3785 = shalt.err (!%p3782_p5)
}
 0x2fa   : > { %s3870_s4 = smov 128   ;;  %s3871_s5 = smov 8   ;;  %v2771_v44 = vrot.slane %v2770_v26, 4  ;;  %v2839_v23 = vadd.f32 %v2838_v43, %v2808_v13  ;;  %vm2846_vm6 = vcmask 1040384  }
 0x2fb   : > { %3641 = dma.vmem_to_hbm [thread:$0]  (%p3932_p4), %s2871_s9, 4096, %s2873_s10, %s2850_s11, %s3870_s4, %s3870_s4, %s3871_s5  }
 0x2fc   : > { %v2772_v63 = vadd.f32 %v2771_v44, %v2770_v26  ;;  %v2840_v41 = vrot.slane %v2839_v23, 4  ;;  %s3010_s29 = sshll.u32 %s4743_s30, 1  ;;  %s3522_s6 = sshll.u32 %s3860_s15, 1 }
 0x2fd   : > { %s2886_s18 = scalar_lea.hbm %s4965_s3, %s3522_s6  ;;  %s200_s9 = scalar_lea.vmem [#allocation4], %s3010_s29 }
 0x2fe   : > { %v2773_v15 = vrot.slane %v2772_v63, 2  ;;  %v2841_v58 = vadd.f32 %v2840_v41, %v2839_v23  ;;  %s2888_s10 = sshll.u32 %s200_s9, 4  ;;  %s2890_s11 = sshll.u32 %s2886_s18, 4  ;;  %s2889_s10 = int_to_ptr.vmem [resolvable:$true] %s2888_s10  ;;  %s2891_s11 = int_to_ptr.hbm [resolvable:$true] %s2890_s11 }
 0x2ff   : > { %s2855_s15 = scalar_lea.sflag [#allocation5], %s4743_s30  ;;  %s3800_s19 = sshra.s32 %s2891_s11, 4  ;;  %s3801_s19 = int_to_ptr.hbm [resolvable:$true] %s3800_s19 }
 0x300   : > { %v2774_v37 = vadd.f32 %v2773_v15, %v2772_v63  ;;  %v2842_v52 = vrot.slane %v2841_v58, 2  ;;  %s3802_s21 = scalar_lea.hbm %s3801_s19, 2  ;;  %s3806_s27 = scalar_lea.hbm %s4965_s3, 4 }
 0x301   : > { %p3803_p6 = scmp.ne.s32.totalorder %s3801_s19, %s3802_s21  ;;  %p3807_p10 = scmp.lt.s32.totalorder %s3801_s19, %s4965_s3 }
 0x302   : > { %v2775_v9 = vrot.slane %v2774_v37, 1  ;;  %v2843_v50 = vadd.f32 %v2842_v52, %v2841_v58  ;;  %p3808_p11 = scmp.lt.s32.totalorder %s3806_s27, %s3802_s21 }
 0x303   : > { %p3804_p7 = pnand %p3803_p6, %p3932_p4 }
 0x304   : > { %v2844_v24 = vrot.slane %v2843_v50, 1  ;;  %v2776_v7 = vadd.f32 %v2775_v9, %v2774_v37  ;;  %p3809_p12 = por %p3808_p11, %p3807_p10 }
 0x305   : > { %p3805_p9 = pneg %p3804_p7 }
 0x306   : > { %v2845_v51 = vadd.f32 %v2844_v24, %v2843_v50 }
 0x307   : > { %p3810_p13 = pnand %p3809_p12, %p3805_p9 }
 0x308   : > { %v2847_v17 = vsel %vm2846_vm6, %v2776_v7, %v2845_v51 }
 0x309   : > { %2848 = vst [vmem:[%s200_s9] sm:$0x3] %v2847_v17 }
 0x30a   : > { %3813 = shalt.err (!%p3810_p13)
}
 0x30b   : > { %3642 = dma.vmem_to_hbm [thread:$0]  (%p3932_p4), %s2889_s10, 32, %s2891_s11, %s2855_s15  }
 0x30c PF: > { %p3652_p0 = scmp.ge.s32.totalorder %s3868_s17, 2  ;;  %s2902_s30 = sand.u32 1, %s3848_s12  }
 0x30d   : > { %s2903_s5 = scalar_lea.sflag [#allocation3], %s2902_s30 }
 0x30e   : > { %p3646_p1 = pnand %p3652_p0, %p3939_p8 }
 0x310   : > { %p3647_p2 = pneg %p3646_p1 }
 0x312   : > { %3839 = dma.done.wait (%p3647_p2), %s2903_s5, 4096  }
 0x313   : > { %3841 = vsyncadd (%p3647_p2), %s2903_s5, 4294963200  ;;  %s2913_s29 = scalar_lea.sflag [#allocation5], %s2902_s30 }
 0x314   : > { %3843 = dma.done.wait (%p3647_p2), %s2913_s29, 32  }
 0x315   : > { %3845 = vsyncadd (%p3647_p2), %s2913_s29, 4294967264  ;;  %s20_s17 = sadd.s32 1, %s3868_s17   ;;  %s5007_s12 = smov %s3852_s13 }
 0x316   : > { %p17_p3 = scmp.ge.s32.totalorder %s20_s17, 4   ;;  %s5008_s13 = smov %s3856_s14 }
 0x317   : > { %s5009_s14 = smov %s3945_s25  ;;  %s5010_s15 = smov %s3864_s16 }
 0x318   : > { %s5011_s16 = smov %s5013_s20  ;;  %19 = sbr.rel (!%p17_p3) target bundleno = 6 (0x6), region = 88 }
 0x31d   :  { %2919 = vsyncpa [#allocation3], 1 }
 0x31e   :  { %2921 = vsyncpa [#allocation3 + $0x1], 1 }
 0x31f   :  { %2922 = vsyncpa [#allocation5], 1 }
 0x320   :  { %2924 = vsyncpa [#allocation5 + $0x1], 1 }

</bundles_post_ra>
